<compile_context>
chip_gen: v6e
topology: v6e:2x2x1
jax: 0.10.0
libtpu: 0.0.40
codegen_flags: <defaults>
</compile_context>

<pallas_src>
import jax
import jax.numpy as jnp
from jax.experimental import pallas as pl
from jax.experimental.pallas import tpu as pltpu


def _round_up(x, m):
    return ((x + m - 1) // m) * m


# Conservative, generation-safe VMEM knobs (v7x has 64 MiB physical VMEM,
# v5e/v6e 128 MiB; scoped defaults 16/32/32 MiB).
VMEM_LIMIT_BYTES = 32 * 1024 * 1024
FUSED_VMEM_BUDGET = 20 * 1024 * 1024
MAX_FUSED_ROWS = 2048          # one-hot (rows, TB) stays cheap below this
MAX_FUSED_TABLE_BYTES = 8 * 1024 * 1024


# ----------------------------------------------------------------------------
# Fused path: gather + multiply + reduce + bias + sigmoid, all in the kernel.
# Gather is an MXU one-hot matmul; beta is folded into an augmented dimension.
# ----------------------------------------------------------------------------
def irt_onehot_kernel(theta_ref, alpha_ref, sid_ref, qid_ref, out_ref):
    # theta_ref: (Da, Sp) f32, column s = [theta[s], 1, 0, ...]
    # alpha_ref: (Da, Qp) f32, column q = [alpha[q], beta[q], 0, ...]
    # sid_ref / qid_ref: (1, TB) int32 batch tiles (batch on lanes)
    # out_ref: (1, TB) f32, lane-dense
    s_pad = theta_ref.shape[1]
    q_pad = alpha_ref.shape[1]
    tbl = out_ref.shape[1]

    sid = sid_ref[...]                                   # (1, TB) int32
    qid = qid_ref[...]                                   # (1, TB) int32

    # One-hot selection matrices built with cheap VPU compares.
    onehot_s = (jax.lax.broadcasted_iota(jnp.int32, (s_pad, tbl), 0)
                == sid).astype(jnp.float32)              # (Sp, TB)
    onehot_q = (jax.lax.broadcasted_iota(jnp.int32, (q_pad, tbl), 0)
                == qid).astype(jnp.float32)              # (Qp, TB)

    # MXU gathers.  HIGHEST precision => exact f32 row selection (one-hot
    # entries are exactly representable in every MXU pass).
    theta_g = jnp.dot(theta_ref[...], onehot_s,
                      precision=jax.lax.Precision.HIGHEST,
                      preferred_element_type=jnp.float32)   # (Da, TB)
    alpha_g = jnp.dot(alpha_ref[...], onehot_q,
                      precision=jax.lax.Precision.HIGHEST,
                      preferred_element_type=jnp.float32)   # (Da, TB)

    # Augmented dot product already contains + beta (ones row x beta row).
    logits = jnp.sum(theta_g * alpha_g, axis=0, keepdims=True)  # (1, TB)
    out_ref[...] = jax.nn.sigmoid(logits)                        # lane-dense


def _pack_aug_tables(theta_w, alpha_w, beta_w):
    """Transpose + augment the embedding tables.

    theta_aug[:, s] = [theta[s, :], 1, 0...]      shape (Da, Sp)
    alpha_aug[:, q] = [alpha[q, :], beta[q], 0..] shape (Da, Qp)
    so that sum_d theta_aug[d, s] * alpha_aug[d, q] = theta[s].alpha[q] + beta[q].
    """
    s, d = theta_w.shape
    q = alpha_w.shape[0]
    da = _round_up(d + 1, 8)
    sp = _round_up(s, 128)
    qp = _round_up(q, 128)

    theta_t = jnp.zeros((da, sp), jnp.float32)
    theta_t = theta_t.at[:d, :s].set(theta_w.T.astype(jnp.float32))
    theta_t = theta_t.at[d, :s].set(1.0)

    alpha_t = jnp.zeros((da, qp), jnp.float32)
    alpha_t = alpha_t.at[:d, :q].set(alpha_w.T.astype(jnp.float32))
    alpha_t = alpha_t.at[d, :q].set(beta_w[:, 0].astype(jnp.float32))
    return theta_t, alpha_t


def _batch_tile(batch, tb):
    """Lane-tile size: multiple of 128, >=2 (ideally 4) grid steps for v7x."""
    b128 = _round_up(batch, 128)
    tb_eff = min(tb, b128)
    if b128 >= 2 * 128:
        tb_eff = min(tb_eff, max(128, _round_up(pl.cdiv(b128, 4), 128)))
    return tb_eff


def _irt_forward_fused(theta_w, alpha_w, beta_w, student_ids, question_ids, tb):
    assert tb % 128 == 0, "tb must be a multiple of 128 lanes"
    batch = student_ids.shape[0]

    theta_t, alpha_t = _pack_aug_tables(theta_w, alpha_w, beta_w)
    da, sp = theta_t.shape
    qp = alpha_t.shape[1]

    tb_eff = _batch_tile(batch, tb)

    # Keep the per-step working set (resident tables + one-hot temporaries +
    # gathered rows + double-buffered id/out tiles) under a budget that fits
    # the scoped VMEM of every generation.
    table_bytes = 4 * da * (sp + qp)
    per_lane_bytes = 4 * (sp + qp + 3 * da + 6)
    tb_budget = max(128,
                    ((FUSED_VMEM_BUDGET - table_bytes) // per_lane_bytes)
                    // 128 * 128)
    tb_eff = min(tb_eff, tb_budget)

    b_pad = _round_up(batch, tb_eff)
    sid = jnp.pad(student_ids.astype(jnp.int32), (0, b_pad - batch)).reshape(1, b_pad)
    qid = jnp.pad(question_ids.astype(jnp.int32), (0, b_pad - batch)).reshape(1, b_pad)

    grid = (b_pad // tb_eff,)
    out = pl.pallas_call(
        irt_onehot_kernel,
        out_shape=jax.ShapeDtypeStruct((1, b_pad), jnp.float32),
        grid_spec=pltpu.PrefetchScalarGridSpec(
            num_scalar_prefetch=0,
            grid=grid,
            in_specs=[
                # Tables: full-array blocks, constant index map -> DMA'd once,
                # resident in VMEM across the whole grid.
                pl.BlockSpec((da, sp), lambda i: (0, 0)),
                pl.BlockSpec((da, qp), lambda i: (0, 0)),
                # Ids: lane-dense (1, TB) batch tiles.
                pl.BlockSpec((1, tb_eff), lambda i: (0, i)),
                pl.BlockSpec((1, tb_eff), lambda i: (0, i)),
            ],
            out_specs=pl.BlockSpec((1, tb_eff), lambda i: (0, i)),
        ),
        compiler_params=pltpu.CompilerParams(
            dimension_semantics=("parallel",),
            vmem_limit_bytes=VMEM_LIMIT_BYTES,
        ),
    )(theta_t, alpha_t, sid, qid)

    return out[0, :batch].reshape(batch, 1)


# ----------------------------------------------------------------------------
# Fallback path (tables too large for VMEM-resident one-hot gather):
# gather in XLA, math in a batch-on-lanes kernel with a lane-dense output.
# ----------------------------------------------------------------------------
def irt_lanes_kernel(theta_ref, alpha_ref, beta_ref, out_ref):
    # theta_ref / alpha_ref: (Dp, TB) f32; beta_ref: (1, TB); out_ref: (1, TB)
    logits = jnp.sum(theta_ref[...] * alpha_ref[...], axis=0, keepdims=True)
    out_ref[...] = jax.nn.sigmoid(logits + beta_ref[...])


def _irt_forward_pregathered(theta_w, alpha_w, beta_w, student_ids, question_ids, tb):
    # TODO(synk): for very large tables, fuse the gather into the kernel with
    # per-row DMAs (pl.Element index_map or manual make_async_copy from HBM)
    # instead of materializing the gathered rows in HBM.
    assert tb % 128 == 0, "tb must be a multiple of 128 lanes"
    batch = student_ids.shape[0]
    d = theta_w.shape[1]
    dp = _round_up(d, 8)

    tb_eff = _batch_tile(batch, tb)
    b_pad = _round_up(batch, tb_eff)

    sid = jnp.pad(student_ids.astype(jnp.int32), (0, b_pad - batch))
    qid = jnp.pad(question_ids.astype(jnp.int32), (0, b_pad - batch))

    # Batch-on-lanes slabs: (Dp, b_pad) inputs, lane-dense (1, b_pad) beta/out.
    theta_g = jnp.zeros((dp, b_pad), jnp.float32).at[:d, :].set(
        jnp.take(theta_w, sid, axis=0).astype(jnp.float32).T)
    alpha_g = jnp.zeros((dp, b_pad), jnp.float32).at[:d, :].set(
        jnp.take(alpha_w, qid, axis=0).astype(jnp.float32).T)
    beta_g = jnp.take(beta_w, qid, axis=0).astype(jnp.float32).T      # (1, b_pad)

    grid = (b_pad // tb_eff,)
    out = pl.pallas_call(
        irt_lanes_kernel,
        out_shape=jax.ShapeDtypeStruct((1, b_pad), jnp.float32),
        grid_spec=pltpu.PrefetchScalarGridSpec(
            num_scalar_prefetch=0,
            grid=grid,
            in_specs=[
                pl.BlockSpec((dp, tb_eff), lambda i: (0, i)),
                pl.BlockSpec((dp, tb_eff), lambda i: (0, i)),
                pl.BlockSpec((1, tb_eff), lambda i: (0, i)),
            ],
            out_specs=pl.BlockSpec((1, tb_eff), lambda i: (0, i)),
        ),
        compiler_params=pltpu.CompilerParams(
            dimension_semantics=("parallel",),
            vmem_limit_bytes=VMEM_LIMIT_BYTES,
        ),
    )(theta_g, alpha_g, beta_g)

    return out[0, :batch].reshape(batch, 1)


# ----------------------------------------------------------------------------
# Public forward.
# ----------------------------------------------------------------------------
def irt_forward(theta_w, alpha_w, beta_w, student_ids, question_ids, *,
                tb_fused=2048, tb_pregather=8192, path="auto"):
    """IRT forward pass.

    path: "auto" | "fused" | "pregather".  Dispatch is a static table-size
    check (no try/except capability probing).
    """
    num_students, num_dim = theta_w.shape
    num_questions = alpha_w.shape[0]

    if path == "auto":
        da = _round_up(num_dim + 1, 8)
        table_bytes = 4 * da * (_round_up(num_students, 128)
                                + _round_up(num_questions, 128))
        fused_ok = (num_students <= MAX_FUSED_ROWS
                    and num_questions <= MAX_FUSED_ROWS
                    and table_bytes <= MAX_FUSED_TABLE_BYTES)
        path = "fused" if fused_ok else "pregather"

    if path == "fused":
        return _irt_forward_fused(theta_w, alpha_w, beta_w,
                                  student_ids, question_ids, tb_fused)
    return _irt_forward_pregathered(theta_w, alpha_w, beta_w,
                                    student_ids, question_ids, tb_pregather)


def xavier_normal(key, shape):
    """PyTorch nn.init.xavier_normal_ for a 2-D weight: std=sqrt(2/(fan_in+fan_out))."""
    fan_out, fan_in = shape
    std = (2.0 / (fan_in + fan_out)) ** 0.5
    return std * jax.random.normal(key, shape, dtype=jnp.float32)


if __name__ == "__main__":
    # Model config (small, deterministic).
    num_students = 64
    num_questions = 32
    num_dim = 32
    batch = 16

    key = jax.random.PRNGKey(0)
    k_theta, k_alpha, k_beta, k_sid, k_qid = jax.random.split(key, 5)

    # Parameters (xavier_normal, matching the PyTorch __init__).
    theta_w = xavier_normal(k_theta, (num_students, num_dim))     # (S, D)
    alpha_w = xavier_normal(k_alpha, (num_questions, num_dim))    # (Q, D)
    beta_w = xavier_normal(k_beta, (num_questions, 1))            # (Q, 1)

    # Inputs: integer id vectors.
    student_ids = jax.random.randint(k_sid, (batch,), 0, num_students, dtype=jnp.int32)
    question_ids = jax.random.randint(k_qid, (batch,), 0, num_questions, dtype=jnp.int32)

    # Reference in plain JAX (same math, no kernel).
    theta_g = jnp.take(theta_w, student_ids, axis=0)
    alpha_g = jnp.take(alpha_w, question_ids, axis=0)
    beta_g = jnp.take(beta_w, question_ids, axis=0)
    ref = jax.nn.sigmoid(jnp.sum(alpha_g * theta_g, axis=1, keepdims=True) + beta_g)

    # Fused (one-hot MXU gather) path.
    pred = irt_forward(theta_w, alpha_w, beta_w, student_ids, question_ids)
    pred = jax.block_until_ready(pred)
    assert pred.shape == (batch, 1), pred.shape
    assert jnp.allclose(pred, ref, atol=1e-5, rtol=1e-5), "fused path mismatch"

    # Pre-gathered batch-on-lanes fallback path (exercised explicitly).
    pred_fb = irt_forward(theta_w, alpha_w, beta_w, student_ids, question_ids,
                          path="pregather")
    pred_fb = jax.block_until_ready(pred_fb)
    assert pred_fb.shape == (batch, 1), pred_fb.shape
    assert jnp.allclose(pred_fb, ref, atol=1e-5, rtol=1e-5), "fallback path mismatch"

    print("KERNEL_OK")
</pallas_src>

<mosaic_0001>
module attributes {stable_mosaic.version = 11 : i64} {
  func.func @irt_onehot_kernel(%arg0: i32, %arg1: memref<40x128xf32, #tpu.memory_space<vmem>>, %arg2: memref<40x128xf32, #tpu.memory_space<vmem>>, %arg3: memref<1x128xi32, #tpu.memory_space<vmem>>, %arg4: memref<1x128xi32, #tpu.memory_space<vmem>>, %arg5: memref<1x128xf32, #tpu.memory_space<vmem>>) attributes {dimension_semantics = [#tpu.dimension_semantics<parallel>], iteration_bounds = array<i64: 1>, scalar_prefetch = 0 : i64, scratch_operands = 0 : i64, tpu.core_type = #tpu.core_type<tc>, window_params = [{pipeline_mode = #tpu.pipeline_mode<synchronous>, transform_indices = @transform_0, window_bounds = array<i64: 40, 128>}, {pipeline_mode = #tpu.pipeline_mode<synchronous>, transform_indices = @transform_1, window_bounds = array<i64: 40, 128>}, {transform_indices = @transform_2, window_bounds = array<i64: 1, 128>}, {transform_indices = @transform_3, window_bounds = array<i64: 1, 128>}, {transform_indices = @transform_4, window_bounds = array<i64: 1, 128>}]} {
    %c0 = arith.constant 0 : index
    %c0_0 = arith.constant 0 : index
    %0 = vector.load %arg3[%c0, %c0_0] : memref<1x128xi32, #tpu.memory_space<vmem>>, vector<1x128xi32>
    %c0_1 = arith.constant 0 : index
    %c0_2 = arith.constant 0 : index
    %1 = vector.load %arg4[%c0_1, %c0_2] : memref<1x128xi32, #tpu.memory_space<vmem>>, vector<1x128xi32>
    %2 = tpu.iota {dimensions = array<i32: 0>} : vector<128x128xi32>
    %3 = vector.broadcast %0 : vector<1x128xi32> to vector<128x128xi32>
    %4 = arith.cmpi eq, %2, %3 : vector<128x128xi32>
    %5 = arith.extui %4 : vector<128x128xi1> to vector<128x128xi32>
    %6 = arith.sitofp %5 : vector<128x128xi32> to vector<128x128xf32>
    %7 = tpu.iota {dimensions = array<i32: 0>} : vector<128x128xi32>
    %8 = vector.broadcast %1 : vector<1x128xi32> to vector<128x128xi32>
    %9 = arith.cmpi eq, %7, %8 : vector<128x128xi32>
    %10 = arith.extui %9 : vector<128x128xi1> to vector<128x128xi32>
    %11 = arith.sitofp %10 : vector<128x128xi32> to vector<128x128xf32>
    %c0_3 = arith.constant 0 : index
    %c0_4 = arith.constant 0 : index
    %12 = vector.load %arg1[%c0_3, %c0_4] : memref<40x128xf32, #tpu.memory_space<vmem>>, vector<40x128xf32>
    %cst = arith.constant dense<0.000000e+00> : vector<40x128xf32>
    %13 = tpu.matmul %12, %6, %cst {dimension_numbers = #tpu.dot_dimension_numbers<[1], [0], [0], [1], [0, 0, 1, 1], [], []>, precision = #tpu.contract_precision<fp32>} : vector<40x128xf32>, vector<128x128xf32>, vector<40x128xf32> -> vector<40x128xf32>
    %c0_5 = arith.constant 0 : index
    %c0_6 = arith.constant 0 : index
    %14 = vector.load %arg2[%c0_5, %c0_6] : memref<40x128xf32, #tpu.memory_space<vmem>>, vector<40x128xf32>
    %cst_7 = arith.constant dense<0.000000e+00> : vector<40x128xf32>
    %15 = tpu.matmul %14, %11, %cst_7 {dimension_numbers = #tpu.dot_dimension_numbers<[1], [0], [0], [1], [0, 0, 1, 1], [], []>, precision = #tpu.contract_precision<fp32>} : vector<40x128xf32>, vector<128x128xf32>, vector<40x128xf32> -> vector<40x128xf32>
    %16 = arith.mulf %13, %15 : vector<40x128xf32>
    %cst_8 = arith.constant dense<0.000000e+00> : vector<128xf32>
    %17 = vector.multi_reduction <add>, %16, %cst_8 [0] : vector<40x128xf32> to vector<128xf32>
    %18 = vector.shape_cast %17 : vector<128xf32> to vector<1x128xf32>
    %19 = arith.negf %18 : vector<1x128xf32>
    %20 = math.exp %19 : vector<1x128xf32>
    %cst_9 = arith.constant 1.000000e+00 : f32
    %21 = vector.broadcast %cst_9 : f32 to vector<1x128xf32>
    %22 = arith.addf %21, %20 : vector<1x128xf32>
    %23 = arith.divf %21, %22 : vector<1x128xf32>
    %c0_10 = arith.constant 0 : index
    %c0_11 = arith.constant 0 : index
    %24 = vector.load %arg5[%c0_10, %c0_11] : memref<1x128xf32, #tpu.memory_space<vmem>>, vector<1x128xf32>
    tpu.vector_store %arg5[%c0_10, %c0_11], %23 {strides = array<i32>} : memref<1x128xf32, #tpu.memory_space<vmem>>, vector<1x128xf32>,
    return
  }
  func.func @transform_0(%arg0: i32) -> (i32, i32) {
    %c0_i32 = arith.constant 0 : i32
    %c0_i32_0 = arith.constant 0 : i32
    %c0_i32_1 = arith.constant 0 : i32
    return %c0_i32, %c0_i32_0 : i32, i32
  }
  func.func @transform_1(%arg0: i32) -> (i32, i32) {
    %c0_i32 = arith.constant 0 : i32
    %c0_i32_0 = arith.constant 0 : i32
    %c0_i32_1 = arith.constant 0 : i32
    return %c0_i32, %c0_i32_0 : i32, i32
  }
  func.func @transform_2(%arg0: i32) -> (i32, i32) {
    %c0_i32 = arith.constant 0 : i32
    %c0_i32_0 = arith.constant 0 : i32
    return %c0_i32, %arg0 : i32, i32
  }
  func.func @transform_3(%arg0: i32) -> (i32, i32) {
    %c0_i32 = arith.constant 0 : i32
    %c0_i32_0 = arith.constant 0 : i32
    return %c0_i32, %arg0 : i32, i32
  }
  func.func @transform_4(%arg0: i32) -> (i32, i32) {
    %c0_i32 = arith.constant 0 : i32
    %c0_i32_0 = arith.constant 0 : i32
    return %c0_i32, %arg0 : i32, i32
  }
}

</mosaic_0001>

<bundles_post_ra>
// kernel: tpu_custom_call.1
= control target key start
LH: loop header
LB: loop body
LE: loop exit
PB: predicated region body
PF: predicated region fallthrough
CT: control target
= control target key end

     0   :  { %9 = vsyncpa [#allocation3], 0  ;;  %s4308_s0 = inlined_call_operand.hbm [shape: f32[40,128], index: 0, kind: input, shape index: {}]   ;;  %s4309_s1 = inlined_call_operand.hbm [shape: f32[40,128], index: 1, kind: input, shape index: {}]   ;;  %s4310_s2 = inlined_call_operand.vmem [shape: s32[1,128], index: 2, kind: input, shape index: {}]   ;;  %s4311_s3 = inlined_call_operand.vmem [shape: s32[1,128], index: 3, kind: input, shape index: {}]   ;;  %s4312_s4 = inlined_call_operand.hbm [shape: f32[1,128], index: 4, kind: output, shape index: {}]  }
   0x1   :  { %10 = vsyncpa [#allocation6], 0 }
   0x2   :  { %11 = vsyncpa [#allocation4], 0  ;;  %s2868_s15 = smov [#allocation2]  }
   0x3   :  { %s17_s16 = sshll.u32 %s2868_s15, 4  ;;  %s18_s16 = int_to_ptr.vmem [resolvable:$true] %s17_s16 }
   0x4   :  { %s2810_s17 = scalar_lea.vmem %s18_s16, 640  ;;  %p2815_p1 = scmp.lt.s32.totalorder %s18_s16, %s18_s16 }
   0x5   :  { %p2811_p0 = scmp.ne.s32.totalorder %s18_s16, %s2810_s17  ;;  %p2816_p2 = scmp.lt.s32.totalorder %s2810_s17, %s2810_s17 }
   0x7   :  { %p2817_p3 = por %p2816_p2, %p2815_p1 }
   0x9   :  { %p2818_p4 = pnand %p2817_p3, %p2811_p0 }
   0xb   :  { %2821 = shalt.err (!%p2818_p4)
}
   0xc   :  { %s2869_s18 = smov 128   ;;  %s2870_s19 = smov 8  }
   0xd   :  { %23 = dma.hbm_to_vmem [thread:$0]  %s4308_s0, 640, %s18_s16, [#allocation3], %s2869_s18, %s2869_s18, %s2870_s19  }
   0xe   :  { %s2871_s22 = smov [#allocation5]  }
   0xf   :  { %s29_s23 = sshll.u32 %s2871_s22, 4  ;;  %s30_s23 = int_to_ptr.vmem [resolvable:$true] %s29_s23 }
  0x10   :  { %s2830_s24 = scalar_lea.vmem %s30_s23, 640  ;;  %p2835_p6 = scmp.lt.s32.totalorder %s30_s23, %s30_s23 }
  0x11   :  { %p2831_p5 = scmp.ne.s32.totalorder %s30_s23, %s2830_s24  ;;  %p2836_p7 = scmp.lt.s32.totalorder %s2830_s24, %s2830_s24 }
  0x13   :  { %p2837_p8 = por %p2836_p7, %p2835_p6 }
  0x15   :  { %p2838_p9 = pnand %p2837_p8, %p2831_p5 }
  0x17   :  { %2841 = shalt.err (!%p2838_p9)
}
  0x18   :  { %35 = dma.hbm_to_vmem [thread:$0]  %s4309_s1, 640, %s30_s23, [#allocation6], %s2869_s18, %s2869_s18, %s2870_s19  }
  0x19   :  { %2862 = dma.done.wait [#allocation3], 640  }
  0x1a   :  { %2863 = vsyncadd [#allocation3], 4294966656 }
  0x1b   :  { %2864 = dma.done.wait [#allocation6], 640  }
  0x1c   :  { %2865 = vsyncadd [#allocation6], 4294966656  ;;  %v48_v0 = vlaneseq  ;;  %v2872_v1 = vmov 0.0   ;;  %vm2873_vm0 = vmmov 0   ;;  %v2933_v8 = vld [vmem:[%s4310_s2] ss:$0 sm:$0xff] }
  0x1d   :  { %2226 = vmatprep.subr.mxu0 %v2872_v1  ;;  %2273 = vmatprep.subr.mxu1 %v2872_v1  ;;  %v2874_v13 = vmov 1.0  }
  0x1e   :  { %v2909_v2 = vshrl.u32 %v48_v0, 7  ;;  %2258 = vmatprep.mubr.msk.f32.mxu0 %vm2873_vm0, %v2872_v1  ;;  %2305 = vmatprep.mubr.msk.f32.mxu1 %vm2873_vm0, %v2872_v1  ;;  %v169_v0 = vld [vmem:[#allocation2] sm:$0xff] }
  0x20   :  { %v2916_v3 = vadd.s32 120, %v2909_v2  ;;  %v2919_v4 = vadd.s32 112, %v2909_v2  ;;  %v2922_v5 = vadd.s32 104, %v2909_v2  ;;  %v2925_v6 = vadd.s32 96, %v2909_v2 }
  0x21   :  { %v2928_v7 = vadd.s32 88, %v2909_v2  ;;  %v2936_v9 = vadd.s32 80, %v2909_v2  ;;  %v2939_v10 = vadd.s32 72, %v2909_v2  ;;  %v2942_v11 = vadd.s32 64, %v2909_v2 }
  0x22   :  { %v2945_v12 = vadd.s32 56, %v2909_v2  ;;  %vm84_vm1 = vcmp.eq.s32.totalorder %v2916_v3, %v2933_v8  ;;  %vm83_vm2 = vcmp.eq.s32.totalorder %v2919_v4, %v2933_v8  ;;  %vm82_vm3 = vcmp.eq.s32.totalorder %v2922_v5, %v2933_v8 }
  0x23   :  { %vm81_vm4 = vcmp.eq.s32.totalorder %v2925_v6, %v2933_v8  ;;  %2227 = vmatpush3.msk.msra.mxu0 %vm84_vm1, %v2874_v13  ;;  %v1858_v14 = vsel %vm83_vm2, 1.0, %v2872_v1  ;;  %v1857_v15 = vsel %vm82_vm3, 1.0, %v2872_v1  ;;  %vm80_vm5 = vcmp.eq.s32.totalorder %v2928_v7, %v2933_v8 }
  0x24   :  { %v1856_v16 = vsel %vm81_vm4, 1.0, %v2872_v1  ;;  %2228 = vmatprep.subr.mxu0 %v2872_v1  ;;  %v2974_v17 = vsub.f32 %v1858_v14, %v1858_v14  ;;  %v2976_v18 = vsub.f32 %v1857_v15, %v1857_v15  ;;  %v1855_v20 = vsel %vm80_vm5, 1.0, %v2872_v1 }
  0x25   :  { %v2978_v19 = vsub.f32 %v1856_v16, %v1856_v16  ;;  %2229 = vmatpush3.msk.msra.mxu0 %vm83_vm2, %v2874_v13  ;;  %v2988_v21 = vsub.f32 %v1855_v20, %v1855_v20  ;;  %v1859_v22 = vsel %vm84_vm1, 1.0, %v2872_v1  ;;  %vm79_vm6 = vcmp.eq.s32.totalorder %v2936_v9, %v2933_v8 }
  0x26   :  { %vm78_vm7 = vcmp.eq.s32.totalorder %v2939_v10, %v2933_v8  ;;  %2230 = vmatprep.subr.mxu0 %v2872_v1  ;;  %v2999_v23 = vsub.f32 %v1859_v22, %v1859_v22  ;;  %v1854_v24 = vsel %vm79_vm6, 1.0, %v2872_v1  ;;  %v315_v25 = vand.u32 4294901760, %v2974_v17 }
  0x27   :  { %v1853_v26 = vsel %vm78_vm7, 1.0, %v2872_v1  ;;  %2231 = vmatpush3.msk.msra.mxu0 %vm82_vm3, %v2874_v13  ;;  %v3014_v27 = vsub.f32 %v1854_v24, %v1854_v24  ;;  %v322_v28 = vand.u32 4294901760, %v2976_v18  ;;  %vm4319_vm8 = vcmp.eq.s32.totalorder %v2942_v11, %v2933_v8 }
  0x28   :  { %v3020_v29 = vadd.s32 48, %v2909_v2  ;;  %2232 = vmatprep.subr.mxu0 %v2872_v1  ;;  %v308_v30 = vand.u32 4294901760, %v2999_v23  ;;  %v316_v31 = vsub.f32 %v2974_v17, %v315_v25  ;;  %v1852_v32 = vsel %vm4319_vm8, 1.0, %v2872_v1 }
  0x29   :  { %v329_v33 = vand.u32 4294901760, %v2978_v19  ;;  %2233 = vmatpush3.msk.msra.mxu0 %vm81_vm4, %v2874_v13  ;;  %v3036_v34 = vsub.f32 %v1853_v26, %v1853_v26  ;;  %vm76_vm9 = vcmp.eq.s32.totalorder %v2945_v12, %v2933_v8  ;;  %v3041_v35 = vadd.s32 40, %v2909_v2 }
  0x2a   :  { %2234 = vmatprep.subr.mxu0 %v2872_v1  ;;  %v309_v36 = vsub.f32 %v2999_v23, %v308_v30  ;;  %v323_v37 = vsub.f32 %v2976_v18, %v322_v28  ;;  %v336_v38 = vand.u32 4294901760, %v2988_v21  ;;  %v3052_v39 = vadd.s32 32, %v2909_v2 }
  0x2b   :  { %2235 = vmatpush3.msk.msra.mxu0 %vm80_vm5, %v2874_v13  ;;  %v3058_v40 = vsub.f32 %v1852_v32, %v1852_v32  ;;  %v1851_v41 = vsel %vm76_vm9, 1.0, %v2872_v1  ;;  %vm4313_vm10 = vcmp.eq.s32.totalorder %v3020_v29, %v2933_v8  ;;  %v3067_v42 = vadd.s32 24, %v2909_v2 }
  0x2c   :  { %2236 = vmatprep.subr.mxu0 %v2872_v1  ;;  %v310_v43 = vand.u32 4294901760, %v309_v36  ;;  %v317_v44 = vand.u32 4294901760, %v316_v31  ;;  %v330_v45 = vsub.f32 %v2978_v19, %v329_v33  ;;  %v343_v46 = vand.u32 4294901760, %v3014_v27 }
  0x2d   :  { %2237 = vmatpush3.msk.msra.mxu0 %vm79_vm6, %v2874_v13  ;;  %v1850_v47 = vsel %vm4313_vm10, 1.0, %v2872_v1  ;;  %vm74_vm11 = vcmp.eq.s32.totalorder %v3041_v35, %v2933_v8  ;;  %v350_v48 = vand.u32 4294901760, %v3036_v34  ;;  %v3086_v49 = vadd.s32 16, %v2909_v2 }
  0x2e   :  { %2274 = vmatpush3.msra.mxu1 %v310_v43  ;;  %2238 = vmatprep.subr.mxu0 %v2872_v1  ;;  %v324_v50 = vand.u32 4294901760, %v323_v37  ;;  %v3089_v51 = vsub.f32 %v1851_v41, %v1851_v41  ;;  %v337_v52 = vsub.f32 %v2988_v21, %v336_v38  ;;  %vm73_vm12 = vcmp.eq.s32.totalorder %v3052_v39, %v2933_v8 }
  0x2f   :  { %2275 = vmatprep.subr.mxu1 %v2872_v1  ;;  %2239 = vmatpush3.msk.msra.mxu0 %vm78_vm7, %v2874_v13  ;;  %v344_v53 = vsub.f32 %v3014_v27, %v343_v46  ;;  %v1849_v54 = vsel %vm74_vm11, 1.0, %v2872_v1  ;;  %v3109_v55 = vadd.s32 8, %v2909_v2  ;;  %v331_v56 = vand.u32 4294901760, %v330_v45 }
  0x30   :  { %2276 = vmatpush3.msra.mxu1 %v317_v44  ;;  %2240 = vmatprep.subr.mxu0 %v2872_v1  ;;  %v3112_v57 = vsub.f32 %v1850_v47, %v1850_v47  ;;  %v357_v58 = vand.u32 4294901760, %v3058_v40  ;;  %vm72_vm13 = vcmp.eq.s32.totalorder %v3067_v42, %v2933_v8  ;;  %v351_v59 = vsub.f32 %v3036_v34, %v350_v48 }
  0x31   :  { %2277 = vmatprep.subr.mxu1 %v2872_v1  ;;  %2241 = vmatpush3.msk.msra.mxu0 %vm4319_vm8, %v2874_v13  ;;  %v1848_v60 = vsel %vm73_vm12, 1.0, %v2872_v1  ;;  %v338_v61 = vand.u32 4294901760, %v337_v52  ;;  %v3130_v62 = vsub.f32 %v1849_v54, %v1849_v54  ;;  %v364_v63 = vand.u32 4294901760, %v3089_v51 }
  0x32   :  { %2278 = vmatpush3.msra.mxu1 %v324_v50  ;;  %2242 = vmatprep.subr.mxu0 %v2872_v1  ;;  %vm71_vm14 = vcmp.eq.s32.totalorder %v3086_v49, %v2933_v8  ;;  %v345_v14 = vand.u32 4294901760, %v344_v53  ;;  %v1847_v15 = vsel %vm72_vm13, 1.0, %v2872_v1  ;;  %v3145_v16 = vsub.f32 %v1848_v60, %v1848_v60 }
  0x33   :  { %2279 = vmatprep.subr.mxu1 %v2872_v1  ;;  %2243 = vmatpush3.msk.msra.mxu0 %vm76_vm9, %v2874_v13  ;;  %v358_v20 = vsub.f32 %v3058_v40, %v357_v58  ;;  %v371_v22 = vand.u32 4294901760, %v3112_v57  ;;  %vm70_vm15 = vcmp.eq.s32.totalorder %v3109_v55, %v2933_v8  ;;  %v352_v24 = vand.u32 4294901760, %v351_v59 }
  0x34   :  { %2280 = vmatpush3.msra.mxu1 %v331_v56  ;;  %2244 = vmatprep.subr.mxu0 %v2872_v1  ;;  %v1846_v26 = vsel %vm71_vm14, 1.0, %v2872_v1  ;;  %v3162_v31 = vand.u32 4294901760, %v169_v0  ;;  %v3165_v32 = vsub.f32 %v1847_v15, %v1847_v15  ;;  %v365_v36 = vsub.f32 %v3089_v51, %v364_v63 }
  0x35   :  { %2281 = vmatprep.subr.mxu1 %v2872_v1  ;;  %2245 = vmatpush3.msk.msra.mxu0 %vm4313_vm10, %v2874_v13  ;;  %v378_v37 = vand.u32 4294901760, %v3130_v62  ;;  %vm69_vm10 = vcmp.eq.s32.totalorder %v2909_v2, %v2933_v8  ;;  %v1845_v41 = vsel %vm70_vm15, 1.0, %v2872_v1  ;;  %v359_v44 = vand.u32 4294901760, %v358_v20 }
  0x36   :  { %2282 = vmatpush3.msra.mxu1 %v338_v61  ;;  %2246 = vmatprep.subr.mxu0 %v2872_v1  ;;  %v3183_v43 = vsub.f32 %v169_v0, %v3162_v31  ;;  %v3186_v45 = vsub.f32 %v1846_v26, %v1846_v26  ;;  %v372_v47 = vsub.f32 %v3112_v57, %v371_v22  ;;  %v4318_v50 = vand.u32 4294901760, %v3145_v16 }
  0x37   :  { %2283 = vmatprep.subr.mxu1 %v2872_v1  ;;  %2247 = vmatpush3.msk.msra.mxu0 %vm74_vm11, %v2874_v13  ;;  %v1844_v52 = vsel %vm69_vm10, 1.0, %v2872_v1  ;;  %v366_v54 = vand.u32 4294901760, %v365_v36  ;;  %v3203_v56 = vsub.f32 %v1845_v41, %v1845_v41  ;;  %v379_v59 = vsub.f32 %v3130_v62, %v378_v37 }
  0x38   :  { %2284 = vmatpush3.msra.mxu1 %v345_v14  ;;  %2248 = vmatprep.subr.mxu0 %v2872_v1  ;;  %v257_v53 = vand.u32 4294901760, %v3183_v43  ;;  %v4315_v60 = vand.u32 4294901760, %v3165_v32  ;;  %v373_v0 = vand.u32 4294901760, %v372_v47  ;;  %v3218_v14 = vsub.f32 %v1844_v52, %v1844_v52 }
  0x39   :  { %2285 = vmatprep.subr.mxu1 %v2872_v1  ;;  %2249 = vmatpush3.msk.msra.mxu0 %vm73_vm12, %v2874_v13  ;;  %v386_v15 = vsub.f32 %v3145_v16, %v4318_v50  ;;  %v4314_v20 = vand.u32 4294901760, %v3186_v45  ;;  %v380_v26 = vand.u32 4294901760, %v379_v59  ;;  %v4317_v41 = vand.u32 4294901760, %v3203_v56 }
  0x3a   :  { %2286 = vmatpush3.msra.mxu1 %v352_v24  ;;  %2250 = vmatprep.subr.mxu0 %v2872_v1  ;;  %v258_v61 = vsub.f32 %v3183_v43, %v257_v53  ;;  %v170_v24 = vld [vmem:[#allocation2 + $0x8] sm:$0xff]  ;;  %v393_v36 = vsub.f32 %v3165_v32, %v4315_v60 }
  0x3b   :  { %2287 = vmatprep.subr.mxu1 %v2872_v1  ;;  %2251 = vmatpush3.msk.msra.mxu0 %vm72_vm13, %v2874_v13  ;;  %v387_v47 = vand.u32 4294901760, %v386_v15  ;;  %v400_v52 = vsub.f32 %v3186_v45, %v4314_v20  ;;  %v3244_v59 = vand.u32 4294901760, %v170_v24  ;;  %v171_v15 = vld [vmem:[#allocation2 + $0x10] sm:$0xff] }
  0x3c   :  { %2288 = vmatpush3.msra.mxu1 %v359_v44  ;;  %2252 = vmatprep.subr.mxu0 %v2872_v1  ;;  %v259_v44 = vand.u32 4294901760, %v258_v61  ;;  %v394_v61 = vand.u32 4294901760, %v393_v36  ;;  %v3265_v36 = vand.u32 4294901760, %v171_v15 }
  0x3d   :  { %2289 = vmatprep.subr.mxu1 %v2872_v1  ;;  %2253 = vmatpush3.msk.msra.mxu0 %vm71_vm14, %v2874_v13  ;;  %v401_v20 = vand.u32 4294901760, %v400_v52  ;;  %v172_v52 = vld [vmem:[#allocation2 + $0x18] sm:$0xff] }
  0x3e   :  { %2290 = vmatpush3.msra.mxu1 %v366_v54  ;;  %2254 = vmatprep.subr.mxu0 %v2872_v1  ;;  %v4316_v54 = vand.u32 4294901760, %v3218_v14 }
  0x3f   :  { %2291 = vmatprep.subr.mxu1 %v2872_v1  ;;  %2255 = vmatpush3.msk.msra.mxu0 %vm70_vm15, %v2874_v13 }
  0x40   :  { %2292 = vmatpush3.msra.mxu1 %v373_v0  ;;  %2256 = vmatprep.subr.mxu0 %v2872_v1  ;;  %v407_v0 = vsub.f32 %v3203_v56, %v4317_v41  ;;  %v414_v60 = vsub.f32 %v3218_v14, %v4316_v54 }
  0x41   :  { %2293 = vmatprep.subr.mxu1 %v2872_v1  ;;  %2257 = vmatpush3.msk.msra.mxu0 %vm69_vm10, %v2874_v13 }
  0x42   :  { %2294 = vmatpush3.msra.mxu1 %v380_v26  ;;  %2320 = vmatprep.subr.mxu0 %v2872_v1  ;;  %v3261_v26 = vsub.f32 %v170_v24, %v3244_v59 }
  0x43   :  { %2295 = vmatprep.subr.mxu1 %v2872_v1  ;;  %2259 = vmatmul.mubr.f32.vlgmr.msra.gmra.mxu0 %v259_v44  ;;  %v408_v44 = vand.u32 4294901760, %v407_v0 }
  0x44   :  { %2296 = vmatpush3.msra.mxu1 %v387_v47  ;;  %2321 = vmatpush3.msra.mxu0 %v2999_v23  ;;  %v415_v47 = vand.u32 4294901760, %v414_v60  ;;  %v267_v24 = vand.u32 4294901760, %v3261_v26 }
  0x45   :  { %2297 = vmatprep.subr.mxu1 %v2872_v1  ;;  %2322 = vmatprep.subr.mxu0 %v2872_v1 }
  0x46   :  { %2298 = vmatpush3.msra.mxu1 %v394_v61  ;;  %2323 = vmatpush3.msra.mxu0 %v2974_v17  ;;  %v3275_v61 = vsub.f32 %v171_v15, %v3265_v36  ;;  %v268_v60 = vsub.f32 %v3261_v26, %v267_v24  ;;  %v173_v15 = vld [vmem:[#allocation2 + $0x20] sm:$0xff] }
  0x47   :  { %2299 = vmatprep.subr.mxu1 %v2872_v1  ;;  %2324 = vmatprep.subr.mxu0 %v2872_v1  ;;  %v3309_v41 = vand.u32 4294901760, %v173_v15  ;;  %v3532_v17 = vld [vmem:[%s4311_s3] ss:$0 sm:$0xff]  ;;  %s2875_s3 = smov [#allocation7]  }
  0x48   :  { %2300 = vmatpush3.msra.mxu1 %v401_v20  ;;  %2325 = vmatpush3.msra.mxu0 %v2976_v18  ;;  %v3280_v20 = vand.u32 4294901760, %v172_v52  ;;  %v277_v0 = vand.u32 4294901760, %v3275_v61  ;;  %v4328_v18 = vand.u32 4294901760, %v3145_v16  ;;  %s1833_s28 = sshll.u32 %s2875_s3, 4  ;;  %s1834_s28 = int_to_ptr.vmem [resolvable:$true] %s1833_s28 }
  0x49   :  { %2301 = vmatprep.subr.mxu1 %v2872_v1  ;;  %2326 = vmatprep.subr.mxu0 %v2872_v1  ;;  %v3327_v50 = vsub.f32 %v173_v15, %v3309_v41  ;;  %s2842_s29 = scalar_lea.vmem %s1834_s28, 16  ;;  %s2846_s30 = scalar_lea.vmem %s1834_s28, 32 }
  0x4a   :  { %2302 = vmatpush3.msra.mxu1 %v408_v44  ;;  %2327 = vmatpush3.msra.mxu0 %v2978_v19  ;;  %v3297_v44 = vsub.f32 %v172_v52, %v3280_v20  ;;  %v278_v54 = vsub.f32 %v3275_v61, %v277_v0  ;;  %v4330_v19 = vand.u32 4294901760, %v3165_v32  ;;  %p2843_p10 = scmp.ne.s32.totalorder %s1834_s28, %s2842_s29  ;;  %p2847_p11 = scmp.lt.s32.totalorder %s1834_s28, %s1834_s28 }
  0x4b   :  { %2303 = vmatprep.subr.mxu1 %v2872_v1  ;;  %2328 = vmatprep.subr.mxu0 %v2872_v1  ;;  %p2848_p12 = scmp.lt.s32.totalorder %s2846_s30, %s2842_s29 }
  0x4c   :  { %2304 = vmatpush3.msra.mxu1 %v415_v47  ;;  %2329 = vmatpush3.msra.mxu0 %v2988_v21  ;;  %v269_v47 = vand.u32 4294901760, %v268_v60  ;;  %v287_v52 = vand.u32 4294901760, %v3297_v44  ;;  %v279_v60 = vand.u32 4294901760, %v278_v54  ;;  %v297_v54 = vand.u32 4294901760, %v3327_v50 }
  0x4d   :  { %2306 = vmatmul.mubr.f32.vlgmr.msra.gmra.mxu1 %v3162_v31  ;;  %2367 = vmatprep.subr.mxu1 %v2872_v1  ;;  %v4331_v21 = vand.u32 4294901760, %v3186_v45  ;;  %p2849_p13 = por %p2848_p12, %p2847_p11 }
  0x4e   :  { %2330 = vmatprep.subr.mxu0 %v2872_v1  ;;  %2368 = vmatpush3.msk.msra.mxu1 %vm84_vm1, %v2874_v13 }
  0x4f   :  { %2331 = vmatpush3.msra.mxu0 %v3014_v27  ;;  %2369 = vmatprep.subr.mxu1 %v2872_v1  ;;  %p2850_p0 = pnand %p2849_p13, %p2843_p10 }
  0x50   :  { %2332 = vmatprep.subr.mxu0 %v2872_v1  ;;  %2370 = vmatpush3.msk.msra.mxu1 %vm83_vm2, %v2874_v13 }
  0x51   :  { %2333 = vmatpush3.msra.mxu0 %v3036_v34  ;;  %2371 = vmatprep.subr.mxu1 %v2872_v1 }
  0x52   :  { %2334 = vmatprep.subr.mxu0 %v2872_v1  ;;  %2372 = vmatpush3.msk.msra.mxu1 %vm82_vm3, %v2874_v13 }
  0x53   :  { %2261 = vmatprep.mubr.msk.f32.mxu0 %vm2873_vm0, %v2872_v1  ;;  %2335 = vmatpush3.msra.mxu0 %v3058_v40 }
  0x54   :  { %2373 = vmatprep.subr.mxu1 %v2872_v1  ;;  %2262 = vmatmul.mubr.f32.gmra.mxu0 %v269_v47  ;;  %v288_v47 = vsub.f32 %v3297_v44, %v287_v52 }
  0x55   :  { %2336 = vmatprep.subr.mxu0 %v2872_v1  ;;  %2374 = vmatpush3.msk.msra.mxu1 %vm81_vm4, %v2874_v13 }
  0x56   :  { %2337 = vmatpush3.msra.mxu0 %v3089_v51  ;;  %2375 = vmatprep.subr.mxu1 %v2872_v1  ;;  %v289_v15 = vand.u32 4294901760, %v288_v47 }
  0x57   :  { %2338 = vmatprep.subr.mxu0 %v2872_v1  ;;  %2376 = vmatpush3.msk.msra.mxu1 %vm80_vm5, %v2874_v13 }
  0x58   :  { %2264 = vmatprep.mubr.msk.f32.mxu0 %vm2873_vm0, %v2872_v1  ;;  %2339 = vmatpush3.msra.mxu0 %v3112_v57 }
  0x59   :  { %2377 = vmatprep.subr.mxu1 %v2872_v1  ;;  %2265 = vmatmul.mubr.f32.gmra.mxu0 %v279_v60  ;;  %v298_v60 = vsub.f32 %v3327_v50, %v297_v54 }
  0x5a   :  { %2340 = vmatprep.subr.mxu0 %v2872_v1  ;;  %2378 = vmatpush3.msk.msra.mxu1 %vm79_vm6, %v2874_v13 }
  0x5b   :  { %2341 = vmatpush3.msra.mxu0 %v3130_v62  ;;  %2379 = vmatprep.subr.mxu1 %v2872_v1  ;;  %v299_v47 = vand.u32 4294901760, %v298_v60 }
  0x5c   :  { %2342 = vmatprep.subr.mxu0 %v2872_v1  ;;  %2380 = vmatpush3.msk.msra.mxu1 %vm78_vm7, %v2874_v13 }
  0x5d   :  { %2267 = vmatprep.mubr.msk.f32.mxu0 %vm2873_vm0, %v2872_v1  ;;  %2308 = vmatprep.mubr.msk.f32.mxu1 %vm2873_vm0, %v2872_v1 }
  0x5e   :  { %2343 = vmatpush3.msra.mxu0 %v3145_v16  ;;  %2381 = vmatprep.subr.mxu1 %v2872_v1 }
  0x5f   :  { %2268 = vmatmul.mubr.f32.gmra.mxu0 %v289_v15  ;;  %2309 = vmatmul.mubr.f32.gmra.mxu1 %v3244_v59 }
  0x60   :  { %2344 = vmatprep.subr.mxu0 %v2872_v1  ;;  %2382 = vmatpush3.msk.msra.mxu1 %vm4319_vm8, %v2874_v13  ;;  %vm4327_vm8 = vcmp.eq.s32.totalorder %v3020_v29, %v2933_v8 }
  0x61   :  { %2345 = vmatpush3.msra.mxu0 %v3165_v32  ;;  %2383 = vmatprep.subr.mxu1 %v2872_v1 }
  0x62   :  { %2346 = vmatprep.subr.mxu0 %v2872_v1  ;;  %2384 = vmatpush3.msk.msra.mxu1 %vm76_vm9, %v2874_v13 }
  0x63   :  { %2270 = vmatprep.mubr.msk.f32.mxu0 %vm2873_vm0, %v2872_v1  ;;  %2311 = vmatprep.mubr.msk.f32.mxu1 %vm2873_vm0, %v2872_v1 }
  0x64   :  { %2347 = vmatpush3.msra.mxu0 %v3186_v45  ;;  %2385 = vmatprep.subr.mxu1 %v2872_v1 }
  0x65   :  { %2271 = vmatmul.mubr.f32.gmra.mxu0 %v299_v47  ;;  %2312 = vmatmul.mubr.f32.gmra.mxu1 %v3265_v36  ;;  %v987_v47 = vld [vmem:[#allocation5] sm:$0xff] }
  0x66   :  { %2348 = vmatprep.subr.mxu0 %v2872_v1  ;;  %2386 = vmatpush3.msk.msra.mxu1 %vm4327_vm8, %v2874_v13 }
  0x67   :  { %2349 = vmatpush3.msra.mxu0 %v3203_v56  ;;  %2387 = vmatprep.subr.mxu1 %v2872_v1 }
  0x68   :  { %2350 = vmatprep.subr.mxu0 %v2872_v1  ;;  %2388 = vmatpush3.msk.msra.mxu1 %vm74_vm11, %v2874_v13 }
  0x69   :  { %2314 = vmatprep.mubr.msk.f32.mxu1 %vm2873_vm0, %v2872_v1  ;;  %2351 = vmatpush3.msra.mxu0 %v3218_v14 }
  0x6a   :  { %2352 = vmatprep.mubr.msk.f32.mxu0 %vm2873_vm0, %v2872_v1  ;;  %2389 = vmatprep.subr.mxu1 %v2872_v1 }
  0x6b   :  { %2315 = vmatmul.mubr.f32.gmra.mxu1 %v3280_v20  ;;  %2353 = vmatmul.mubr.f32.vlgmr.msra.gmra.mxu0 %v3183_v43 }
  0x6c   :  { %2390 = vmatpush3.msk.msra.mxu1 %vm73_vm12, %v2874_v13  ;;  %2414 = vmatprep.subr.mxu0 %v2872_v1 }
  0x6d   :  { %2391 = vmatprep.subr.mxu1 %v2872_v1  ;;  %2415 = vmatpush3.msra.mxu0 %v308_v30 }
  0x6e   :  { %2392 = vmatpush3.msk.msra.mxu1 %vm72_vm13, %v2874_v13  ;;  %2416 = vmatprep.subr.mxu0 %v2872_v1 }
  0x6f   :  { %2317 = vmatprep.mubr.msk.f32.mxu1 %vm2873_vm0, %v2872_v1  ;;  %2355 = vmatprep.mubr.msk.f32.mxu0 %vm2873_vm0, %v2872_v1 }
  0x70   :  { %2393 = vmatprep.subr.mxu1 %v2872_v1  ;;  %2417 = vmatpush3.msra.mxu0 %v315_v25  ;;  %v4333_v25 = vand.u32 4294901760, %v3203_v56 }
  0x71   :  { %2318 = vmatmul.mubr.f32.gmra.mxu1 %v3309_v41  ;;  %2356 = vmatmul.mubr.f32.gmra.mxu0 %v3261_v26 }
  0x72   :  { %2394 = vmatpush3.msk.msra.mxu1 %vm71_vm14, %v2874_v13  ;;  %2418 = vmatprep.subr.mxu0 %v2872_v1 }
  0x73   :  { %2395 = vmatprep.subr.mxu1 %v2872_v1  ;;  %2419 = vmatpush3.msra.mxu0 %v322_v28  ;;  %v4334_v28 = vand.u32 4294901760, %v3218_v14 }
  0x74   :  { %2396 = vmatpush3.msk.msra.mxu1 %vm70_vm15, %v2874_v13  ;;  %2420 = vmatprep.subr.mxu0 %v2872_v1 }
  0x75   :  { %2358 = vmatprep.mubr.msk.f32.mxu0 %vm2873_vm0, %v2872_v1  ;;  %2397 = vmatprep.subr.mxu1 %v2872_v1 }
  0x76   :  { %2421 = vmatpush3.msra.mxu0 %v329_v33  ;;  %2398 = vmatpush3.msk.msra.mxu1 %vm69_vm10, %v2874_v13 }
  0x77   :  { %2359 = vmatmul.mubr.f32.gmra.mxu0 %v3275_v61  ;;  %2399 = vmatprep.mubr.msk.f32.mxu1 %vm2873_vm0, %v2872_v1 }
  0x78   :  { %2422 = vmatprep.subr.mxu0 %v2872_v1  ;;  %2400 = vmatmul.mubr.f32.vlgmr.msra.gmra.mxu1 %v257_v53 }
  0x79   :  { %2423 = vmatpush3.msra.mxu0 %v336_v38  ;;  %2461 = vmatprep.subr.mxu1 %v2872_v1 }
  0x7a   :  { %2424 = vmatprep.subr.mxu0 %v2872_v1  ;;  %2462 = vmatpush3.msk.msra.mxu1 %vm84_vm1, %v2874_v13  ;;  %vm4329_vm1 = vcmp.eq.s32.totalorder %v2942_v11, %v2933_v8 }
  0x7b   :  { %2361 = vmatprep.mubr.msk.f32.mxu0 %vm2873_vm0, %v2872_v1  ;;  %2425 = vmatpush3.msra.mxu0 %v343_v46 }
  0x7c   :  { %2463 = vmatprep.subr.mxu1 %v2872_v1  ;;  %2362 = vmatmul.mubr.f32.gmra.mxu0 %v3297_v44 }
  0x7d   :  { %2402 = vmatprep.mubr.msk.f32.mxu1 %vm2873_vm0, %v2872_v1  ;;  %2426 = vmatprep.subr.mxu0 %v2872_v1 }
  0x7e   :  { %2464 = vmatpush3.msk.msra.mxu1 %vm83_vm2, %v2874_v13  ;;  %2427 = vmatpush3.msra.mxu0 %v350_v48  ;;  %vm136_vm2 = vcmp.eq.s32.totalorder %v2916_v3, %v3532_v17 }
  0x7f   :  { %2403 = vmatmul.mubr.f32.gmra.mxu1 %v267_v24  ;;  %2465 = vmatprep.subr.mxu1 %v2872_v1  ;;  %v1876_v23 = vsel %vm136_vm2, 1.0, %v2872_v1 }
  0x80   :  { %2428 = vmatprep.subr.mxu0 %v2872_v1  ;;  %2466 = vmatpush3.msk.msra.mxu1 %vm82_vm3, %v2874_v13  ;;  %vm4332_vm3 = vmmov %vm4327_vm8  ;;  %v3578_v27 = vsub.f32 %v1876_v23, %v1876_v23  ;;  %vm131_vm8 = vcmp.eq.s32.totalorder %v2936_v9, %v3532_v17 }
  0x81   :  { %2364 = vmatprep.mubr.msk.f32.mxu0 %vm2873_vm0, %v2872_v1  ;;  %2429 = vmatpush3.msra.mxu0 %v357_v58 }
  0x82   :  { %2467 = vmatprep.subr.mxu1 %v2872_v1  ;;  %2365 = vmatmul.mubr.f32.gmra.mxu0 %v3327_v50  ;;  %v1126_v38 = vand.u32 4294901760, %v3578_v27 }
  0x83   :  { %2405 = vmatprep.mubr.msk.f32.mxu1 %vm2873_vm0, %v2872_v1  ;;  %2430 = vmatprep.subr.mxu0 %v2872_v1 }
  0x84   :  { %2468 = vmatpush3.msk.msra.mxu1 %vm81_vm4, %v2874_v13  ;;  %2431 = vmatpush3.msra.mxu0 %v364_v63  ;;  %vm135_vm4 = vcmp.eq.s32.totalorder %v2919_v4, %v3532_v17  ;;  %v1127_v48 = vsub.f32 %v3578_v27, %v1126_v38 }
  0x85   :  { %2406 = vmatmul.mubr.f32.gmra.mxu1 %v277_v0  ;;  %2469 = vmatprep.subr.mxu1 %v2872_v1  ;;  %v1875_v30 = vsel %vm135_vm4, 1.0, %v2872_v1 }
  0x86   :  { %2432 = vmatprep.subr.mxu0 %v2872_v1  ;;  %2470 = vmatpush3.msk.msra.mxu1 %vm80_vm5, %v2874_v13  ;;  %vm134_vm5 = vcmp.eq.s32.totalorder %v2922_v5, %v3532_v17  ;;  %v3606_v34 = vsub.f32 %v1875_v30, %v1875_v30  ;;  %v1128_v16 = vand.u32 4294901760, %v1127_v48  ;;  %v3788_v30 = vand.u32 4294901760, %v987_v47 }
  0x87   :  { %2433 = vmatpush3.msra.mxu0 %v371_v22  ;;  %2471 = vmatprep.subr.mxu1 %v2872_v1  ;;  %v1874_v33 = vsel %vm134_vm5, 1.0, %v2872_v1  ;;  %v1871_v22 = vsel %vm131_vm8, 1.0, %v2872_v1 }
  0x88   :  { %2408 = vmatprep.mubr.msk.f32.mxu1 %vm2873_vm0, %v2872_v1  ;;  %2434 = vmatprep.subr.mxu0 %v2872_v1  ;;  %v3619_v40 = vsub.f32 %v1874_v33, %v1874_v33  ;;  %v1133_v51 = vand.u32 4294901760, %v3606_v34 }
  0x89   :  { %2472 = vmatpush3.msk.msra.mxu1 %vm79_vm6, %v2874_v13  ;;  %2435 = vmatpush3.msra.mxu0 %v378_v37  ;;  %vm133_vm6 = vcmp.eq.s32.totalorder %v2925_v6, %v3532_v17 }
  0x8a   :  { %2409 = vmatmul.mubr.f32.gmra.mxu1 %v287_v52  ;;  %2473 = vmatprep.subr.mxu1 %v2872_v1  ;;  %v1873_v46 = vsel %vm133_vm6, 1.0, %v2872_v1  ;;  %v1140_v62 = vand.u32 4294901760, %v3619_v40  ;;  %v1134_v32 = vsub.f32 %v3606_v34, %v1133_v51 }
  0x8b   :  { %2436 = vmatprep.subr.mxu0 %v2872_v1  ;;  %2474 = vmatpush3.msk.msra.mxu1 %vm78_vm7, %v2874_v13  ;;  %vm132_vm7 = vcmp.eq.s32.totalorder %v2928_v7, %v3532_v17  ;;  %v3657_v58 = vsub.f32 %v1873_v46, %v1873_v46 }
  0x8c   :  { %2437 = vmatpush3.msra.mxu0 %v4328_v18  ;;  %2475 = vmatprep.subr.mxu1 %v2872_v1  ;;  %v1872_v57 = vsel %vm132_vm7, 1.0, %v2872_v1  ;;  %v1141_v37 = vsub.f32 %v3619_v40, %v1140_v62  ;;  %v1135_v45 = vand.u32 4294901760, %v1134_v32 }
  0x8d   :  { %2411 = vmatprep.mubr.msk.f32.mxu1 %vm2873_vm0, %v2872_v1  ;;  %2438 = vmatprep.subr.mxu0 %v2872_v1  ;;  %v3673_v63 = vsub.f32 %v1872_v57, %v1872_v57  ;;  %v1147_v43 = vand.u32 4294901760, %v3657_v58 }
  0x8e   :  { %2476 = vmatpush3.msk.msra.mxu1 %vm4329_vm1, %v2874_v13  ;;  %2439 = vmatpush3.msra.mxu0 %v4330_v19  ;;  %v1142_v14 = vand.u32 4294901760, %v1141_v37  ;;  %vm123_vm1 = vcmp.eq.s32.totalorder %v3086_v49, %v3532_v17 }
  0x8f   :  { %2412 = vmatmul.mubr.f32.gmra.mxu1 %v297_v54  ;;  %2477 = vmatprep.subr.mxu1 %v2872_v1  ;;  %v1154_v50 = vand.u32 4294901760, %v3673_v63  ;;  %v1148_v26 = vsub.f32 %v3657_v58, %v1147_v43 }
  0x90   :  { %2440 = vmatprep.subr.mxu0 %v2872_v1  ;;  %2478 = vmatpush3.msk.msra.mxu1 %vm76_vm9, %v2874_v13  ;;  %vm130_vm9 = vcmp.eq.s32.totalorder %v2939_v10, %v3532_v17 }
  0x91   :  { %2441 = vmatpush3.msra.mxu0 %v4331_v21  ;;  %2479 = vmatprep.subr.mxu1 %v2872_v1  ;;  %v1870_v8 = vsel %vm130_vm9, 1.0, %v2872_v1  ;;  %v1155_v44 = vsub.f32 %v3673_v63, %v1154_v50  ;;  %v1149_v15 = vand.u32 4294901760, %v1148_v26 }
  0x92   :  { %2442 = vmatprep.subr.mxu0 %v2872_v1  ;;  %2480 = vmatpush3.msk.msra.mxu1 %vm4332_vm3, %v2874_v13  ;;  %v3714_v53 = vsub.f32 %v1870_v8, %v1870_v8  ;;  %vm122_vm3 = vcmp.eq.s32.totalorder %v3109_v55, %v3532_v17  ;;  %v3820_v8 = vsub.f32 %v987_v47, %v3788_v30 }
  0x93   :  { %2443 = vmatpush3.msra.mxu0 %v4333_v25  ;;  %2481 = vmatprep.subr.mxu1 %v2872_v1  ;;  %v1156_v19 = vand.u32 4294901760, %v1155_v44  ;;  %v1862_v44 = vsel %vm122_vm3, 1.0, %v2872_v1 }
  0x94   :  { %2444 = vmatprep.subr.mxu0 %v2872_v1  ;;  %2482 = vmatpush3.msk.msra.mxu1 %vm74_vm11, %v2874_v13  ;;  %vm128_vm11 = vcmp.eq.s32.totalorder %v2945_v12, %v3532_v17  ;;  %v1168_v54 = vand.u32 4294901760, %v3714_v53 }
  0x95   :  { %2445 = vmatpush3.msra.mxu0 %v4334_v28  ;;  %2446 = vmatprep.mubr.msk.f32.mxu0 %vm2873_vm0, %v2872_v1  ;;  %v1868_v24 = vsel %vm128_vm11, 1.0, %v2872_v1 }
  0x96   :  { %2483 = vmatprep.subr.mxu1 %v2872_v1  ;;  %2447 = vmatmul.mubr.f32.vlgmr.msra.gmra.mxu0 %v3162_v31  ;;  %v3754_v60 = vsub.f32 %v1868_v24, %v1868_v24  ;;  %v1169_v25 = vsub.f32 %v3714_v53, %v1168_v54 }
  0x97   :  { %2484 = vmatpush3.msk.msra.mxu1 %vm73_vm12, %v2874_v13  ;;  %2508 = vmatprep.subr.mxu0 %v2872_v1  ;;  %vm4320_vm12 = vcmp.eq.s32.totalorder %v3020_v29, %v3532_v17 }
  0x98   :  { %2485 = vmatprep.subr.mxu1 %v2872_v1  ;;  %2509 = vmatpush3.msk.msra.mxu0 %vm136_vm2, %v2874_v13  ;;  %v1867_v52 = vsel %vm4320_vm12, 1.0, %v2872_v1  ;;  %v1182_v46 = vand.u32 4294901760, %v3754_v60  ;;  %v1170_v32 = vand.u32 4294901760, %v1169_v25 }
  0x99   :  { %2486 = vmatpush3.msk.msra.mxu1 %vm72_vm13, %v2874_v13  ;;  %2510 = vmatprep.subr.mxu0 %v2872_v1  ;;  %vm126_vm13 = vcmp.eq.s32.totalorder %v3041_v35, %v3532_v17  ;;  %v3773_v21 = vsub.f32 %v1867_v52, %v1867_v52 }
  0x9a   :  { %2449 = vmatprep.mubr.msk.f32.mxu0 %vm2873_vm0, %v2872_v1  ;;  %2487 = vmatprep.subr.mxu1 %v2872_v1  ;;  %v1866_v18 = vsel %vm126_vm13, 1.0, %v2872_v1  ;;  %v1183_v37 = vsub.f32 %v3754_v60, %v1182_v46 }
  0x9b   :  { %2511 = vmatpush3.msk.msra.mxu0 %vm135_vm4, %v2874_v13  ;;  %2488 = vmatpush3.msk.msra.mxu1 %vm71_vm14, %v2874_v13  ;;  %vm125_vm14 = vcmp.eq.s32.totalorder %v3052_v39, %v3532_v17  ;;  %v3794_v33 = vsub.f32 %v1866_v18, %v1866_v18 }
  0x9c   :  { %2450 = vmatmul.mubr.f32.gmra.mxu0 %v3244_v59  ;;  %2512 = vmatprep.subr.mxu0 %v2872_v1  ;;  %v1865_v28 = vsel %vm125_vm14, 1.0, %v2872_v1  ;;  %v1184_v47 = vand.u32 4294901760, %v1183_v37 }
  0x9d   :  { %2489 = vmatprep.subr.mxu1 %v2872_v1  ;;  %2513 = vmatpush3.msk.msra.mxu0 %vm134_vm5, %v2874_v13  ;;  %v3802_v57 = vsub.f32 %v1865_v28, %v1865_v28 }
  0x9e   :  { %2490 = vmatpush3.msk.msra.mxu1 %vm70_vm15, %v2874_v13  ;;  %2514 = vmatprep.subr.mxu0 %v2872_v1  ;;  %vm124_vm15 = vcmp.eq.s32.totalorder %v3067_v42, %v3532_v17 }
  0x9f   :  { %2452 = vmatprep.mubr.msk.f32.mxu0 %vm2873_vm0, %v2872_v1  ;;  %2491 = vmatprep.subr.mxu1 %v2872_v1  ;;  %v4325_v52 = vand.u32 4294901760, %v3802_v57  ;;  %v4336_v5 = vand.u32 4294901760, %v3802_v57 }
  0xa0   :  { %2515 = vmatpush3.msk.msra.mxu0 %vm133_vm6, %v2874_v13  ;;  %2492 = vmatpush3.msk.msra.mxu1 %vm69_vm10, %v2874_v13  ;;  %vm4326_vm10 = vcmp.eq.s32.totalorder %v2942_v11, %v3532_v17 }
  0xa1   :  { %2453 = vmatmul.mubr.f32.gmra.mxu0 %v3265_v36  ;;  %2493 = vmatprep.mubr.msk.f32.mxu1 %vm2873_vm0, %v2872_v1  ;;  %v1869_v56 = vsel %vm4326_vm10, 1.0, %v2872_v1 }
  0xa2   :  { %2516 = vmatprep.subr.mxu0 %v2872_v1  ;;  %2494 = vmatmul.mubr.f32.vlgmr.msra.gmra.mxu1 %v3162_v31  ;;  %v3702_v31 = vsub.f32 %v1871_v22, %v1871_v22  ;;  %v3739_v0 = vsub.f32 %v1869_v56, %v1869_v56  ;;  %v1189_v22 = vand.u32 4294901760, %v3773_v21  ;;  %v1196_v56 = vand.u32 4294901760, %v3794_v33 }
  0xa3   :  { %2517 = vmatpush3.msk.msra.mxu0 %vm132_vm7, %v2874_v13  ;;  %2555 = vmatprep.subr.mxu1 %v2872_v1 }
  0xa4   :  { %2518 = vmatprep.subr.mxu0 %v2872_v1  ;;  %2556 = vmatpush3.msra.mxu1 %v1128_v16  ;;  %v1161_v61 = vand.u32 4294901760, %v3702_v31  ;;  %v1175_v23 = vand.u32 4294901760, %v3739_v0  ;;  %v1190_v24 = vsub.f32 %v3773_v21, %v1189_v22 }
  0xa5   :  { %2455 = vmatprep.mubr.msk.f32.mxu0 %vm2873_vm0, %v2872_v1  ;;  %2519 = vmatpush3.msk.msra.mxu0 %vm131_vm8, %v2874_v13 }
  0xa6   :  { %2557 = vmatprep.subr.mxu1 %v2872_v1  ;;  %2456 = vmatmul.mubr.f32.gmra.mxu0 %v3280_v20  ;;  %v1176_v16 = vsub.f32 %v3739_v0, %v1175_v23  ;;  %v1191_v28 = vand.u32 4294901760, %v1190_v24 }
  0xa7   :  { %2496 = vmatprep.mubr.msk.f32.mxu1 %vm2873_vm0, %v2872_v1  ;;  %2520 = vmatprep.subr.mxu0 %v2872_v1 }
  0xa8   :  { %2558 = vmatpush3.msra.mxu1 %v1135_v45  ;;  %2521 = vmatpush3.msk.msra.mxu0 %vm130_vm9, %v2874_v13  ;;  %v1863_v45 = vsel %vm123_vm1, 1.0, %v2872_v1  ;;  %v1177_v26 = vand.u32 4294901760, %v1176_v16 }
  0xa9   :  { %2497 = vmatmul.mubr.f32.gmra.mxu1 %v3244_v59  ;;  %2559 = vmatprep.subr.mxu1 %v2872_v1  ;;  %v1162_v59 = vsub.f32 %v3702_v31, %v1161_v61 }
  0xaa   :  { %2522 = vmatprep.subr.mxu0 %v2872_v1  ;;  %2560 = vmatpush3.msra.mxu1 %v1142_v14 }
  0xab   :  { %2458 = vmatprep.mubr.msk.f32.mxu0 %vm2873_vm0, %v2872_v1  ;;  %2523 = vmatpush3.msk.msra.mxu0 %vm4326_vm10, %v2874_v13  ;;  %v1163_v48 = vand.u32 4294901760, %v1162_v59  ;;  %v1197_v59 = vsub.f32 %v3794_v33, %v1196_v56 }
  0xac   :  { %2561 = vmatprep.subr.mxu1 %v2872_v1  ;;  %2459 = vmatmul.mubr.f32.gmra.mxu0 %v3309_v41 }
  0xad   :  { %2499 = vmatprep.mubr.msk.f32.mxu1 %vm2873_vm0, %v2872_v1  ;;  %2524 = vmatprep.subr.mxu0 %v2872_v1  ;;  %v1198_v37 = vand.u32 4294901760, %v1197_v59 }
  0xae   :  { %2562 = vmatpush3.msra.mxu1 %v1149_v15  ;;  %2525 = vmatpush3.msk.msra.mxu0 %vm128_vm11, %v2874_v13  ;;  %v3852_v15 = vsub.f32 %v1863_v45, %v1863_v45 }
  0xaf   :  { %2500 = vmatmul.mubr.f32.gmra.mxu1 %v3265_v36  ;;  %2563 = vmatprep.subr.mxu1 %v2872_v1  ;;  %v1864_v36 = vsel %vm124_vm15, 1.0, %v2872_v1 }
  0xb0   :  { %2526 = vmatprep.subr.mxu0 %v2872_v1  ;;  %2564 = vmatpush3.msra.mxu1 %v1156_v19  ;;  %v3837_v14 = vsub.f32 %v1864_v36, %v1864_v36  ;;  %v3870_v19 = vsub.f32 %v1862_v44, %v1862_v44  ;;  %v4339_v10 = vand.u32 4294901760, %v3852_v15 }
  0xb1   :  { %2527 = vmatpush3.msk.msra.mxu0 %vm4320_vm12, %v2874_v13  ;;  %2565 = vmatprep.subr.mxu1 %v2872_v1  ;;  %vm121_vm12 = vcmp.eq.s32.totalorder %v2909_v2, %v3532_v17 }
  0xb2   :  { %2502 = vmatprep.mubr.msk.f32.mxu1 %vm2873_vm0, %v2872_v1  ;;  %2528 = vmatprep.subr.mxu0 %v2872_v1  ;;  %v1861_v18 = vsel %vm121_vm12, 1.0, %v2872_v1  ;;  %v4324_v25 = vand.u32 4294901760, %v3837_v14  ;;  %v4322_v45 = vand.u32 4294901760, %v3870_v19  ;;  %v4338_v6 = vand.u32 4294901760, %v3837_v14 }
  0xb3   :  { %2566 = vmatpush3.msra.mxu1 %v1163_v48  ;;  %2529 = vmatpush3.msk.msra.mxu0 %vm126_vm13, %v2874_v13  ;;  %v1204_v48 = vsub.f32 %v3802_v57, %v4325_v52  ;;  %v3882_v16 = vsub.f32 %v1861_v18, %v1861_v18 }
  0xb4   :  { %2503 = vmatmul.mubr.f32.gmra.mxu1 %v3280_v20  ;;  %2567 = vmatprep.subr.mxu1 %v2872_v1  ;;  %v1075_v20 = vand.u32 4294901760, %v3820_v8 }
  0xb5   :  { %2530 = vmatprep.subr.mxu0 %v2872_v1  ;;  %2568 = vmatpush3.msra.mxu1 %v1170_v32  ;;  %v4321_v32 = vand.u32 4294901760, %v3852_v15  ;;  %v1205_v24 = vand.u32 4294901760, %v1204_v48  ;;  %v4323_v59 = vand.u32 4294901760, %v3882_v16  ;;  %v1225_v48 = vsub.f32 %v3870_v19, %v4322_v45 }
  0xb6   :  { %2531 = vmatpush3.msk.msra.mxu0 %vm125_vm14, %v2874_v13  ;;  %2569 = vmatprep.subr.mxu1 %v2872_v1  ;;  %v1076_v36 = vsub.f32 %v3820_v8, %v1075_v20  ;;  %v4342_v12 = vand.u32 4294901760, %v3882_v16 }
  0xb7   :  { %2505 = vmatprep.mubr.msk.f32.mxu1 %vm2873_vm0, %v2872_v1  ;;  %2532 = vmatprep.subr.mxu0 %v2872_v1 }
  0xb8   :  { %2570 = vmatpush3.msra.mxu1 %v1177_v26  ;;  %2533 = vmatpush3.msk.msra.mxu0 %vm124_vm15, %v2874_v13  ;;  %v988_v26 = vld [vmem:[#allocation5 + $0x8] sm:$0xff]  ;;  %v1077_v44 = vand.u32 4294901760, %v1076_v36  ;;  %v989_v36 = vld [vmem:[#allocation5 + $0x10] sm:$0xff] }
  0xb9   :  { %2506 = vmatmul.mubr.f32.gmra.mxu1 %v3309_v41  ;;  %2571 = vmatprep.subr.mxu1 %v2872_v1  ;;  %v1211_v41 = vsub.f32 %v3837_v14, %v4324_v25  ;;  %v3909_v18 = vand.u32 4294901760, %v988_v26  ;;  %v3931_v45 = vand.u32 4294901760, %v989_v36 }
  0xba   :  { %2534 = vmatprep.subr.mxu0 %v2872_v1  ;;  %2572 = vmatpush3.msra.mxu1 %v1184_v47  ;;  %v1218_v47 = vsub.f32 %v3852_v15, %v4321_v32  ;;  %v1232_v32 = vsub.f32 %v3882_v16, %v4323_v59 }
  0xbb   :  { %2535 = vmatpush3.msk.msra.mxu0 %vm123_vm1, %v2874_v13  ;;  %2573 = vmatprep.subr.mxu1 %v2872_v1 }
  0xbc   :  { %2536 = vmatprep.subr.mxu0 %v2872_v1  ;;  %2574 = vmatpush3.msra.mxu1 %v1191_v28  ;;  %v1212_v28 = vand.u32 4294901760, %v1211_v41  ;;  %v3928_v41 = vsub.f32 %v988_v26, %v3909_v18 }
  0xbd   :  { %2537 = vmatpush3.msk.msra.mxu0 %vm122_vm3, %v2874_v13  ;;  %2575 = vmatprep.subr.mxu1 %v2872_v1 }
  0xbe   :  { %2538 = vmatprep.subr.mxu0 %v2872_v1  ;;  %2576 = vmatpush3.msra.mxu1 %v1198_v37  ;;  %v1219_v37 = vand.u32 4294901760, %v1218_v47  ;;  %v1085_v26 = vand.u32 4294901760, %v3928_v41  ;;  %v990_v47 = vld [vmem:[#allocation5 + $0x18] sm:$0xff] }
  0xbf   :  { %2539 = vmatpush3.msk.msra.mxu0 %vm121_vm12, %v2874_v13  ;;  %2577 = vmatprep.subr.mxu1 %v2872_v1 }
  0xc0   :  { %2540 = vmatprep.mubr.msk.f32.mxu0 %vm2873_vm0, %v2872_v1  ;;  %2578 = vmatpush3.msra.mxu1 %v1205_v24  ;;  %v1226_v24 = vand.u32 4294901760, %v1225_v48  ;;  %v1086_v48 = vsub.f32 %v3928_v41, %v1085_v26 }
  0xc1   :  { %2602 = vmatprep.subr.mxu0 %v2872_v1  ;;  %2541 = vmatmul.mubr.f32.vlgmr.msra.gmra.mxu0 %v1077_v44  ;;  %v1233_v44 = vand.u32 4294901760, %v1232_v32  ;;  %v3947_v32 = vand.u32 4294901760, %v990_v47 }
  0xc2   :  { %2579 = vmatprep.subr.mxu1 %v2872_v1  ;;  %2603 = vmatpush3.msra.mxu0 %v3578_v27  ;;  %v4341_v27 = vand.u32 4294901760, %v3870_v19 }
  0xc3   :  { %2580 = vmatpush3.msra.mxu1 %v1212_v28  ;;  %2604 = vmatprep.subr.mxu0 %v2872_v1  ;;  %v3941_v28 = vsub.f32 %v989_v36, %v3931_v45 }
  0xc4   :  { %2581 = vmatprep.subr.mxu1 %v2872_v1  ;;  %2605 = vmatpush3.msra.mxu0 %v3606_v34 }
  0xc5   :  { %2582 = vmatpush3.msra.mxu1 %v1219_v37  ;;  %2606 = vmatprep.subr.mxu0 %v2872_v1  ;;  %v1095_v36 = vand.u32 4294901760, %v3941_v28  ;;  %v991_v37 = vld [vmem:[#allocation5 + $0x20] sm:$0xff] }
  0xc6   :  { %2583 = vmatprep.subr.mxu1 %v2872_v1  ;;  %2607 = vmatpush3.msra.mxu0 %v3619_v40  ;;  %v3977_v25 = vand.u32 4294901760, %v991_v37 }
  0xc7   :  { %2584 = vmatpush3.msra.mxu1 %v1226_v24  ;;  %2608 = vmatprep.subr.mxu0 %v2872_v1  ;;  %v3965_v24 = vsub.f32 %v990_v47, %v3947_v32  ;;  %v1096_v59 = vsub.f32 %v3941_v28, %v1095_v36 }
  0xc8   :  { %2585 = vmatprep.subr.mxu1 %v2872_v1  ;;  %2609 = vmatpush3.msra.mxu0 %v3657_v58  ;;  %v3995_v52 = vsub.f32 %v991_v37, %v3977_v25 }
  0xc9   :  { %2586 = vmatpush3.msra.mxu1 %v1233_v44  ;;  %2587 = vmatprep.mubr.msk.f32.mxu1 %vm2873_vm0, %v2872_v1  ;;  %v1087_v44 = vand.u32 4294901760, %v1086_v48  ;;  %v1105_v47 = vand.u32 4294901760, %v3965_v24  ;;  %v1097_v48 = vand.u32 4294901760, %v1096_v59 }
  0xca   :  { %2610 = vmatprep.subr.mxu0 %v2872_v1  ;;  %2588 = vmatmul.mubr.f32.vlgmr.msra.gmra.mxu1 %v3788_v30  ;;  %v1115_v59 = vand.u32 4294901760, %v3995_v52 }
  0xcb   :  { %2611 = vmatpush3.msra.mxu0 %v3673_v63  ;;  %2649 = vmatprep.subr.mxu1 %v2872_v1 }
  0xcc   :  { %2612 = vmatprep.subr.mxu0 %v2872_v1  ;;  %2650 = vmatpush3.msk.msra.mxu1 %vm136_vm2, %v2874_v13 }
  0xcd   :  { %2613 = vmatpush3.msra.mxu0 %v3702_v31  ;;  %2651 = vmatprep.subr.mxu1 %v2872_v1 }
  0xce   :  { %2614 = vmatprep.subr.mxu0 %v2872_v1  ;;  %2652 = vmatpush3.msk.msra.mxu1 %vm135_vm4, %v2874_v13 }
  0xcf   :  { %2615 = vmatpush3.msra.mxu0 %v3714_v53  ;;  %2653 = vmatprep.subr.mxu1 %v2872_v1 }
  0xd0   :  { %2616 = vmatprep.subr.mxu0 %v2872_v1  ;;  %2654 = vmatpush3.msk.msra.mxu1 %vm134_vm5, %v2874_v13 }
  0xd1   :  { %2543 = vmatprep.mubr.msk.f32.mxu0 %vm2873_vm0, %v2872_v1  ;;  %2617 = vmatpush3.msra.mxu0 %v3739_v0 }
  0xd2   :  { %2655 = vmatprep.subr.mxu1 %v2872_v1  ;;  %2544 = vmatmul.mubr.f32.gmra.mxu0 %v1087_v44  ;;  %v1106_v44 = vsub.f32 %v3965_v24, %v1105_v47 }
  0xd3   :  { %2618 = vmatprep.subr.mxu0 %v2872_v1  ;;  %2656 = vmatpush3.msk.msra.mxu1 %vm133_vm6, %v2874_v13 }
  0xd4   :  { %2619 = vmatpush3.msra.mxu0 %v3754_v60  ;;  %2657 = vmatprep.subr.mxu1 %v2872_v1  ;;  %v1107_v37 = vand.u32 4294901760, %v1106_v44 }
  0xd5   :  { %2620 = vmatprep.subr.mxu0 %v2872_v1  ;;  %2658 = vmatpush3.msk.msra.mxu1 %vm132_vm7, %v2874_v13 }
  0xd6   :  { %2546 = vmatprep.mubr.msk.f32.mxu0 %vm2873_vm0, %v2872_v1  ;;  %2621 = vmatpush3.msra.mxu0 %v3773_v21 }
  0xd7   :  { %2659 = vmatprep.subr.mxu1 %v2872_v1  ;;  %2547 = vmatmul.mubr.f32.gmra.mxu0 %v1097_v48  ;;  %v1116_v48 = vsub.f32 %v3995_v52, %v1115_v59 }
  0xd8   :  { %2622 = vmatprep.subr.mxu0 %v2872_v1  ;;  %2660 = vmatpush3.msk.msra.mxu1 %vm131_vm8, %v2874_v13 }
  0xd9   :  { %2623 = vmatpush3.msra.mxu0 %v3794_v33  ;;  %2661 = vmatprep.subr.mxu1 %v2872_v1  ;;  %v1117_v44 = vand.u32 4294901760, %v1116_v48 }
  0xda   :  { %2624 = vmatprep.subr.mxu0 %v2872_v1  ;;  %2662 = vmatpush3.msk.msra.mxu1 %vm130_vm9, %v2874_v13 }
  0xdb   :  { %2549 = vmatprep.mubr.msk.f32.mxu0 %vm2873_vm0, %v2872_v1  ;;  %2590 = vmatprep.mubr.msk.f32.mxu1 %vm2873_vm0, %v2872_v1 }
  0xdc   :  { %2625 = vmatpush3.msra.mxu0 %v3802_v57  ;;  %2663 = vmatprep.subr.mxu1 %v2872_v1 }
  0xdd   :  { %2550 = vmatmul.mubr.f32.gmra.mxu0 %v1107_v37  ;;  %2591 = vmatmul.mubr.f32.gmra.mxu1 %v3909_v18 }
  0xde   :  { %2626 = vmatprep.subr.mxu0 %v2872_v1  ;;  %2664 = vmatpush3.msk.msra.mxu1 %vm4326_vm10, %v2874_v13  ;;  %vm4335_vm10 = vcmp.eq.s32.totalorder %v3020_v29, %v3532_v17 }
  0xdf   :  { %2627 = vmatpush3.msra.mxu0 %v3837_v14  ;;  %2665 = vmatprep.subr.mxu1 %v2872_v1 }
  0xe0   :  { %2628 = vmatprep.subr.mxu0 %v2872_v1  ;;  %2666 = vmatpush3.msk.msra.mxu1 %vm128_vm11, %v2874_v13 }
  0xe1   :  { %2552 = vmatprep.mubr.msk.f32.mxu0 %vm2873_vm0, %v2872_v1  ;;  %2593 = vmatprep.mubr.msk.f32.mxu1 %vm2873_vm0, %v2872_v1 }
  0xe2   :  { %2629 = vmatpush3.msra.mxu0 %v3852_v15  ;;  %2667 = vmatprep.subr.mxu1 %v2872_v1 }
  0xe3   :  { %2553 = vmatmul.mubr.f32.gmra.mxu0 %v1117_v44  ;;  %2594 = vmatmul.mubr.f32.gmra.mxu1 %v3931_v45 }
  0xe4   :  { %2630 = vmatprep.subr.mxu0 %v2872_v1  ;;  %2668 = vmatpush3.msk.msra.mxu1 %vm4335_vm10, %v2874_v13 }
  0xe5   :  { %2631 = vmatpush3.msra.mxu0 %v3870_v19  ;;  %2669 = vmatprep.subr.mxu1 %v2872_v1 }
  0xe6   :  { %2632 = vmatprep.subr.mxu0 %v2872_v1  ;;  %2670 = vmatpush3.msk.msra.mxu1 %vm126_vm13, %v2874_v13 }
  0xe7   :  { %2596 = vmatprep.mubr.msk.f32.mxu1 %vm2873_vm0, %v2872_v1  ;;  %2633 = vmatpush3.msra.mxu0 %v3882_v16 }
  0xe8   :  { %2634 = vmatprep.mubr.msk.f32.mxu0 %vm2873_vm0, %v2872_v1  ;;  %2671 = vmatprep.subr.mxu1 %v2872_v1 }
  0xe9   :  { %2597 = vmatmul.mubr.f32.gmra.mxu1 %v3947_v32  ;;  %2635 = vmatmul.mubr.f32.vlgmr.msra.gmra.mxu0 %v3820_v8 }
  0xea   :  { %2672 = vmatpush3.msk.msra.mxu1 %vm125_vm14, %v2874_v13  ;;  %2696 = vmatprep.subr.mxu0 %v2872_v1 }
  0xeb   :  { %2673 = vmatprep.subr.mxu1 %v2872_v1  ;;  %2697 = vmatpush3.msra.mxu0 %v1126_v38 }
  0xec   :  { %2674 = vmatpush3.msk.msra.mxu1 %vm124_vm15, %v2874_v13  ;;  %2698 = vmatprep.subr.mxu0 %v2872_v1 }
  0xed   :  { %2599 = vmatprep.mubr.msk.f32.mxu1 %vm2873_vm0, %v2872_v1  ;;  %2637 = vmatprep.mubr.msk.f32.mxu0 %vm2873_vm0, %v2872_v1 }
  0xee   :  { %2675 = vmatprep.subr.mxu1 %v2872_v1  ;;  %2699 = vmatpush3.msra.mxu0 %v1133_v51 }
  0xef   :  { %2600 = vmatmul.mubr.f32.gmra.mxu1 %v3977_v25  ;;  %2638 = vmatmul.mubr.f32.gmra.mxu0 %v3928_v41 }
  0xf0   :  { %2676 = vmatpush3.msk.msra.mxu1 %vm123_vm1, %v2874_v13  ;;  %2700 = vmatprep.subr.mxu0 %v2872_v1 }
  0xf1   :  { %2677 = vmatprep.subr.mxu1 %v2872_v1  ;;  %2701 = vmatpush3.msra.mxu0 %v1140_v62 }
  0xf2   :  { %2678 = vmatpush3.msk.msra.mxu1 %vm122_vm3, %v2874_v13  ;;  %2702 = vmatprep.subr.mxu0 %v2872_v1 }
  0xf3   :  { %2640 = vmatprep.mubr.msk.f32.mxu0 %vm2873_vm0, %v2872_v1  ;;  %2679 = vmatprep.subr.mxu1 %v2872_v1 }
  0xf4   :  { %2703 = vmatpush3.msra.mxu0 %v1147_v43  ;;  %2680 = vmatpush3.msk.msra.mxu1 %vm121_vm12, %v2874_v13 }
  0xf5   :  { %2641 = vmatmul.mubr.f32.gmra.mxu0 %v3941_v28  ;;  %2681 = vmatprep.mubr.msk.f32.mxu1 %vm2873_vm0, %v2872_v1 }
  0xf6   :  { %2704 = vmatprep.subr.mxu0 %v2872_v1  ;;  %2682 = vmatmul.mubr.f32.vlgmr.msra.gmra.mxu1 %v1075_v20 }
  0xf7   :  { %2705 = vmatpush3.msra.mxu0 %v1154_v50  ;;  %2743 = vmatprep.subr.mxu1 %v2872_v1 }
  0xf8   :  { %2706 = vmatprep.subr.mxu0 %v2872_v1  ;;  %2744 = vmatpush3.msk.msra.mxu1 %vm136_vm2, %v2874_v13  ;;  %vm4337_vm2 = vcmp.eq.s32.totalorder %v2942_v11, %v3532_v17 }
  0xf9   :  { %2643 = vmatprep.mubr.msk.f32.mxu0 %vm2873_vm0, %v2872_v1  ;;  %2707 = vmatpush3.msra.mxu0 %v1161_v61 }
  0xfa   :  { %2745 = vmatprep.subr.mxu1 %v2872_v1  ;;  %2644 = vmatmul.mubr.f32.gmra.mxu0 %v3965_v24 }
  0xfb   :  { %2684 = vmatprep.mubr.msk.f32.mxu1 %vm2873_vm0, %v2872_v1  ;;  %2708 = vmatprep.subr.mxu0 %v2872_v1 }
  0xfc   :  { %2746 = vmatpush3.msk.msra.mxu1 %vm135_vm4, %v2874_v13  ;;  %2709 = vmatpush3.msra.mxu0 %v1168_v54  ;;  %vm4340_vm4 = vmmov %vm4335_vm10 }
  0xfd   :  { %2685 = vmatmul.mubr.f32.gmra.mxu1 %v1085_v26  ;;  %2747 = vmatprep.subr.mxu1 %v2872_v1 }
  0xfe   :  { %2710 = vmatprep.subr.mxu0 %v2872_v1  ;;  %2748 = vmatpush3.msk.msra.mxu1 %vm134_vm5, %v2874_v13 }
  0xff   :  { %2646 = vmatprep.mubr.msk.f32.mxu0 %vm2873_vm0, %v2872_v1  ;;  %2711 = vmatpush3.msra.mxu0 %v1175_v23 }
 0x100   :  { %2749 = vmatprep.subr.mxu1 %v2872_v1  ;;  %2647 = vmatmul.mubr.f32.gmra.mxu0 %v3995_v52 }
 0x101   :  { %2687 = vmatprep.mubr.msk.f32.mxu1 %vm2873_vm0, %v2872_v1  ;;  %2712 = vmatprep.subr.mxu0 %v2872_v1 }
 0x102   :  { %2750 = vmatpush3.msk.msra.mxu1 %vm133_vm6, %v2874_v13  ;;  %2713 = vmatpush3.msra.mxu0 %v1182_v46 }
 0x103   :  { %2688 = vmatmul.mubr.f32.gmra.mxu1 %v1095_v36  ;;  %2751 = vmatprep.subr.mxu1 %v2872_v1  ;;  %v261_v3 = vpop.f32.mrf.mxu0 }
 0x104   :  { %2714 = vmatprep.subr.mxu0 %v2872_v1  ;;  %2752 = vmatpush3.msk.msra.mxu1 %vm132_vm7, %v2874_v13 }
 0x105   :  { %2715 = vmatpush3.msra.mxu0 %v1189_v22  ;;  %2753 = vmatprep.subr.mxu1 %v2872_v1  ;;  %v2260_v4 = vpop.f32.mrf.mxu0 }
 0x106   :  { %2690 = vmatprep.mubr.msk.f32.mxu1 %vm2873_vm0, %v2872_v1  ;;  %2716 = vmatprep.subr.mxu0 %v2872_v1 }
 0x107   :  { %2754 = vmatpush3.msk.msra.mxu1 %vm131_vm8, %v2874_v13  ;;  %2717 = vmatpush3.msra.mxu0 %v1196_v56 }
 0x108   :  { %2691 = vmatmul.mubr.f32.gmra.mxu1 %v1105_v47  ;;  %2755 = vmatprep.subr.mxu1 %v2872_v1 }
 0x109   :  { %2718 = vmatprep.subr.mxu0 %v2872_v1  ;;  %2756 = vmatpush3.msk.msra.mxu1 %vm130_vm9, %v2874_v13 }
 0x10a   :  { %2719 = vmatpush3.msra.mxu0 %v4336_v5  ;;  %2757 = vmatprep.subr.mxu1 %v2872_v1 }
 0x10b   :  { %2693 = vmatprep.mubr.msk.f32.mxu1 %vm2873_vm0, %v2872_v1  ;;  %2720 = vmatprep.subr.mxu0 %v2872_v1 }
 0x10c   :  { %2758 = vmatpush3.msk.msra.mxu1 %vm4337_vm2, %v2874_v13  ;;  %2721 = vmatpush3.msra.mxu0 %v4338_v6 }
 0x10d   :  { %2694 = vmatmul.mubr.f32.gmra.mxu1 %v1115_v59  ;;  %2759 = vmatprep.subr.mxu1 %v2872_v1  ;;  %v452_v7 = vpop.f32.mrf.mxu1 }
 0x10e   :  { %2722 = vmatprep.subr.mxu0 %v2872_v1  ;;  %2760 = vmatpush3.msk.msra.mxu1 %vm128_vm11, %v2874_v13  ;;  %v453_v9 = vadd.f32 %v452_v7, %v261_v3 }
 0x10f   :  { %2723 = vmatpush3.msra.mxu0 %v4339_v10  ;;  %2761 = vmatprep.subr.mxu1 %v2872_v1  ;;  %v2307_v11 = vpop.f32.mrf.mxu1 }
 0x110   :  { %2724 = vmatprep.subr.mxu0 %v2872_v1  ;;  %2762 = vmatpush3.msk.msra.mxu1 %vm4340_vm4, %v2874_v13 }
 0x111   :  { %2725 = vmatpush3.msra.mxu0 %v4341_v27  ;;  %2763 = vmatprep.subr.mxu1 %v2872_v1 }
 0x112   :  { %2726 = vmatprep.subr.mxu0 %v2872_v1  ;;  %2764 = vmatpush3.msk.msra.mxu1 %vm126_vm13, %v2874_v13 }
 0x113   :  { %2727 = vmatpush3.msra.mxu0 %v4342_v12  ;;  %2728 = vmatprep.mubr.msk.f32.mxu0 %vm2873_vm0, %v2872_v1 }
 0x114   :  { %2765 = vmatprep.subr.mxu1 %v2872_v1  ;;  %2729 = vmatmul.mubr.f32.vlgmr.msra.gmra.mxu0 %v3788_v30  ;;  %v271_v29 = vpop.f32.mrf.mxu0 }
 0x115   :  { %2766 = vmatpush3.msk.msra.mxu1 %vm125_vm14, %v2874_v13  ;;  %2731 = vmatprep.mubr.msk.f32.mxu0 %vm2873_vm0, %v2872_v1 }
 0x116   :  { %2767 = vmatprep.subr.mxu1 %v2872_v1  ;;  %2775 = vmatprep.mubr.msk.f32.mxu1 %vm2873_vm0, %v2872_v1  ;;  %v2263_v35 = vpop.f32.mrf.mxu0 }
 0x117   :  { %2768 = vmatpush3.msk.msra.mxu1 %vm124_vm15, %v2874_v13 }
 0x118   :  { %2769 = vmatprep.subr.mxu1 %v2872_v1  ;;  %2732 = vmatmul.mubr.f32.gmra.mxu0 %v3909_v18 }
 0x119   :  { %2770 = vmatpush3.msk.msra.mxu1 %vm123_vm1, %v2874_v13  ;;  %2734 = vmatprep.mubr.msk.f32.mxu0 %vm2873_vm0, %v2872_v1  ;;  %v281_v39 = vpop.f32.mrf.mxu0 }
 0x11a   :  { %2771 = vmatprep.subr.mxu1 %v2872_v1 }
 0x11b   :  { %2772 = vmatpush3.msk.msra.mxu1 %vm122_vm3, %v2874_v13  ;;  %v2266_v42 = vpop.f32.mrf.mxu0 }
 0x11c   :  { %2773 = vmatprep.subr.mxu1 %v2872_v1  ;;  %2735 = vmatmul.mubr.f32.gmra.mxu0 %v3931_v45 }
 0x11d   :  { %2774 = vmatpush3.msk.msra.mxu1 %vm121_vm12, %v2874_v13  ;;  %2737 = vmatprep.mubr.msk.f32.mxu0 %vm2873_vm0, %v2872_v1 }
 0x11e   :  { %2776 = vmatmul.mubr.f32.vlgmr.msra.gmra.mxu1 %v3788_v30 }
 0x11f   :  { %2778 = vmatprep.mubr.msk.f32.mxu1 %vm2873_vm0, %v2872_v1  ;;  %v291_v49 = vpop.f32.mrf.mxu0  ;;  %v458_v55 = vpop.f32.mrf.mxu1 }
 0x120   :  { %2738 = vmatmul.mubr.f32.gmra.mxu0 %v3947_v32  ;;  %v459_v34 = vadd.f32 %v458_v55, %v271_v29 }
 0x121   :  { %2740 = vmatprep.mubr.msk.f32.mxu0 %vm2873_vm0, %v2872_v1  ;;  %v2269_v38 = vpop.f32.mrf.mxu0  ;;  %v2310_v40 = vpop.f32.mrf.mxu1 }
 0x122   :  { %2779 = vmatmul.mubr.f32.gmra.mxu1 %v3909_v18 }
 0x123   :  { %2781 = vmatprep.mubr.msk.f32.mxu1 %vm2873_vm0, %v2872_v1 }
 0x124   :  { %2741 = vmatmul.mubr.f32.gmra.mxu0 %v3977_v25 }
 0x125   :  { %v301_v2 = vpop.f32.mrf.mxu0  ;;  %v464_v13 = vpop.f32.mrf.mxu1 }
 0x126   :  { %2782 = vmatmul.mubr.f32.gmra.mxu1 %v3931_v45  ;;  %v465_v17 = vadd.f32 %v464_v13, %v281_v39 }
 0x127   :  { %2784 = vmatprep.mubr.msk.f32.mxu1 %vm2873_vm0, %v2872_v1  ;;  %v2272_v51 = vpop.f32.mrf.mxu0  ;;  %v2313_v58 = vpop.f32.mrf.mxu1 }
 0x12a   :  { %2785 = vmatmul.mubr.f32.gmra.mxu1 %v3947_v32 }
 0x12b   :  { %2787 = vmatprep.mubr.msk.f32.mxu1 %vm2873_vm0, %v2872_v1  ;;  %v470_v62 = vpop.f32.mrf.mxu1  ;;  %v580_v63 = vpop.f32.mrf.mxu0 }
 0x12c   :  { %v471_v43 = vadd.f32 %v470_v62, %v291_v49  ;;  %v581_v31 = vadd.f32 %v580_v63, %v453_v9 }
 0x12d   :  { %v2316_v50 = vpop.f32.mrf.mxu1  ;;  %v2354_v53 = vpop.f32.mrf.mxu0 }
 0x12e   :  { %2788 = vmatmul.mubr.f32.gmra.mxu1 %v3977_v25 }
 0x131   :  { %v476_v61 = vpop.f32.mrf.mxu1  ;;  %v587_v0 = vpop.f32.mrf.mxu0 }
 0x132   :  { %v477_v54 = vadd.f32 %v476_v61, %v301_v2  ;;  %v588_v60 = vadd.f32 %v587_v0, %v459_v34 }
 0x133   :  { %v2319_v21 = vpop.f32.mrf.mxu1  ;;  %v2357_v23 = vpop.f32.mrf.mxu0 }
 0x137   :  { %v594_v30 = vpop.f32.mrf.mxu0 }
 0x138   :  { %v595_v33 = vadd.f32 %v594_v30, %v465_v17  ;;  %v697_v46 = vpop.f32.mrf.mxu1 }
 0x139   :  { %v698_v57 = vadd.f32 %v697_v46, %v581_v31  ;;  %v2360_v22 = vpop.f32.mrf.mxu0 }
 0x13a   :  { %v2401_v1 = vpop.f32.mrf.mxu1 }
 0x13c   :  { %v601_v8 = vpop.f32.mrf.mxu0 }
 0x13d   :  { %v602_v56 = vadd.f32 %v601_v8, %v471_v43 }
 0x13e   :  { %v2363_v14 = vpop.f32.mrf.mxu0 }
 0x13f   :  { %v705_v52 = vpop.f32.mrf.mxu1 }
 0x140   :  { %v706_v15 = vadd.f32 %v705_v52, %v588_v60 }
 0x141   :  { %v2404_v20 = vpop.f32.mrf.mxu1 }
 0x142   :  { %v608_v19 = vpop.f32.mrf.mxu0 }
 0x143   :  { %v609_v25 = vadd.f32 %v608_v19, %v477_v54 }
 0x144   :  { %v2366_v16 = vpop.f32.mrf.mxu0 }
 0x145   :  { %v713_v45 = vpop.f32.mrf.mxu1 }
 0x146   :  { %v714_v18 = vadd.f32 %v713_v45, %v595_v33 }
 0x147   :  { %v2407_v41 = vpop.f32.mrf.mxu1 }
 0x14a   :  { %v721_v26 = vpop.f32.mrf.mxu1 }
 0x14b   :  { %v722_v28 = vadd.f32 %v721_v26, %v602_v56 }
 0x14c   :  { %v2410_v32 = vpop.f32.mrf.mxu1 }
 0x14f   :  { %v729_v36 = vpop.f32.mrf.mxu1 }
 0x150   :  { %v730_v24 = vadd.f32 %v729_v36, %v609_v25 }
 0x151   :  { %v2413_v47 = vpop.f32.mrf.mxu1 }
 0x156   :  { %v848_v59 = vpop.f32.mrf.mxu0 }
 0x157   :  { %v849_v37 = vadd.f32 %v848_v59, %v698_v57 }
 0x158   :  { %v2448_v48 = vpop.f32.mrf.mxu0 }
 0x15c   :  { %v854_v44 = vpop.f32.mrf.mxu0 }
 0x15d   :  { %v855_v3 = vadd.f32 %v854_v44, %v706_v15 }
 0x15e   :  { %v2451_v4 = vpop.f32.mrf.mxu0 }
 0x161   :  { %v860_v5 = vpop.f32.mrf.mxu0 }
 0x162   :  { %v861_v6 = vadd.f32 %v860_v5, %v714_v18  ;;  %v959_v7 = vpop.f32.mrf.mxu1 }
 0x163   :  { %v4290_v9 = vadd.f32 %v959_v7, %v849_v37  ;;  %v2454_v10 = vpop.f32.mrf.mxu0 }
 0x164   :  { %v2495_v11 = vpop.f32.mrf.mxu1 }
 0x166   :  { %v866_v27 = vpop.f32.mrf.mxu0 }
 0x167   :  { %v867_v12 = vadd.f32 %v866_v27, %v722_v28 }
 0x168   :  { %v2457_v29 = vpop.f32.mrf.mxu0 }
 0x169   :  { %v965_v35 = vpop.f32.mrf.mxu1 }
 0x16a   :  { %v4292_v39 = vadd.f32 %v965_v35, %v855_v3 }
 0x16b   :  { %v2498_v42 = vpop.f32.mrf.mxu1 }
 0x16c   :  { %v872_v49 = vpop.f32.mrf.mxu0 }
 0x16d   :  { %v873_v55 = vadd.f32 %v872_v49, %v730_v24 }
 0x16e   :  { %v2460_v34 = vpop.f32.mrf.mxu0 }
 0x16f   :  { %v971_v38 = vpop.f32.mrf.mxu1 }
 0x170   :  { %v4294_v40 = vadd.f32 %v971_v38, %v861_v6 }
 0x171   :  { %v2501_v2 = vpop.f32.mrf.mxu1 }
 0x174   :  { %v977_v13 = vpop.f32.mrf.mxu1 }
 0x175   :  { %v4296_v17 = vadd.f32 %v977_v13, %v867_v12 }
 0x176   :  { %v2504_v51 = vpop.f32.mrf.mxu1 }
 0x179   :  { %v983_v58 = vpop.f32.mrf.mxu1 }
 0x17a   :  { %v4298_v62 = vadd.f32 %v983_v58, %v873_v55 }
 0x17b   :  { %v2507_v63 = vpop.f32.mrf.mxu1 }
 0x181   :  { %v1079_v43 = vpop.f32.mrf.mxu0 }
 0x183   :  { %v2542_v31 = vpop.f32.mrf.mxu0 }
 0x18a   :  { %v1270_v50 = vpop.f32.mrf.mxu1 }
 0x18b   :  { %v1271_v53 = vadd.f32 %v1270_v50, %v1079_v43 }
 0x18c   :  { %v2589_v61 = vpop.f32.mrf.mxu1 }
 0x192   :  { %v1089_v0 = vpop.f32.mrf.mxu0 }
 0x194   :  { %v2545_v54 = vpop.f32.mrf.mxu0 }
 0x197   :  { %v1099_v60 = vpop.f32.mrf.mxu0 }
 0x199   :  { %v2548_v21 = vpop.f32.mrf.mxu0 }
 0x19d   :  { %v1109_v23 = vpop.f32.mrf.mxu0  ;;  %v1276_v30 = vpop.f32.mrf.mxu1 }
 0x19e   :  { %v1277_v33 = vadd.f32 %v1276_v30, %v1089_v0 }
 0x19f   :  { %v2551_v46 = vpop.f32.mrf.mxu0  ;;  %v2592_v57 = vpop.f32.mrf.mxu1 }
 0x1a3   :  { %v1119_v22 = vpop.f32.mrf.mxu0  ;;  %v1282_v1 = vpop.f32.mrf.mxu1 }
 0x1a4   :  { %v1283_v38 = vadd.f32 %v1282_v1, %v1099_v60 }
 0x1a5   :  { %v2554_v8 = vpop.f32.mrf.mxu0  ;;  %v2595_v56 = vpop.f32.mrf.mxu1 }
 0x1a9   :  { %v1288_v14 = vpop.f32.mrf.mxu1  ;;  %v1398_v52 = vpop.f32.mrf.mxu0 }
 0x1aa   :  { %v1399_v27 = vadd.f32 %v1398_v52, %v1271_v53  ;;  %v1289_v0 = vadd.f32 %v1288_v14, %v1109_v23 }
 0x1ab   :  { %v2598_v15 = vpop.f32.mrf.mxu1  ;;  %v2636_v20 = vpop.f32.mrf.mxu0 }
 0x1af   :  { %v1294_v19 = vpop.f32.mrf.mxu1  ;;  %v1405_v25 = vpop.f32.mrf.mxu0 }
 0x1b0   :  { %v1406_v42 = vadd.f32 %v1405_v25, %v1277_v33  ;;  %v1295_v8 = vadd.f32 %v1294_v19, %v1119_v22 }
 0x1b1   :  { %v2601_v16 = vpop.f32.mrf.mxu1  ;;  %v2639_v45 = vpop.f32.mrf.mxu0 }
 0x1b5   :  { %v1412_v18 = vpop.f32.mrf.mxu0 }
 0x1b6   :  { %v1515_v41 = vpop.f32.mrf.mxu1  ;;  %v1413_v63 = vadd.f32 %v1412_v18, %v1283_v38 }
 0x1b7   :  { %v2642_v26 = vpop.f32.mrf.mxu0  ;;  %v1516_v29 = vadd.f32 %v1515_v41, %v1399_v27 }
 0x1b8   :  { %v2683_v28 = vpop.f32.mrf.mxu1 }
 0x1ba   :  { %v1419_v32 = vpop.f32.mrf.mxu0 }
 0x1bb   :  { %v1420_v33 = vadd.f32 %v1419_v32, %v1289_v0 }
 0x1bc   :  { %v2645_v36 = vpop.f32.mrf.mxu0 }
 0x1bd   :  { %v1523_v24 = vpop.f32.mrf.mxu1 }
 0x1be   :  { %v1524_v2 = vadd.f32 %v1523_v24, %v1406_v42 }
 0x1bf   :  { %v2686_v47 = vpop.f32.mrf.mxu1 }
 0x1c0   :  { %v1426_v59 = vpop.f32.mrf.mxu0 }
 0x1c1   :  { %v1427_v25 = vadd.f32 %v1426_v59, %v1295_v8 }
 0x1c2   :  { %v2648_v37 = vpop.f32.mrf.mxu0 }
 0x1c3   :  { %v1531_v48 = vpop.f32.mrf.mxu1 }
 0x1c4   :  { %v1532_v53 = vadd.f32 %v1531_v48, %v1413_v63 }
 0x1c5   :  { %v2689_v44 = vpop.f32.mrf.mxu1 }
 0x1c8   :  { %v1539_v3 = vpop.f32.mrf.mxu1 }
 0x1c9   :  { %v1540_v56 = vadd.f32 %v1539_v3, %v1420_v33 }
 0x1ca   :  { %v2692_v4 = vpop.f32.mrf.mxu1 }
 0x1cd   :  { %v1547_v5 = vpop.f32.mrf.mxu1 }
 0x1ce   :  { %v1548_v14 = vadd.f32 %v1547_v5, %v1427_v25 }
 0x1cf   :  { %v2695_v6 = vpop.f32.mrf.mxu1 }
 0x1d4   :  { %v1666_v7 = vpop.f32.mrf.mxu0 }
 0x1d5   :  { %v1667_v49 = vadd.f32 %v1666_v7, %v1516_v29 }
 0x1d6   :  { %v2730_v10 = vpop.f32.mrf.mxu0 }
 0x1d8   :  { %v1672_v11 = vpop.f32.mrf.mxu0 }
 0x1d9   :  { %v1673_v43 = vadd.f32 %v1672_v11, %v1524_v2 }
 0x1da   :  { %v2733_v12 = vpop.f32.mrf.mxu0 }
 0x1dc   :  { %v1678_v35 = vpop.f32.mrf.mxu0 }
 0x1dd   :  { %v1679_v46 = vadd.f32 %v1678_v35, %v1532_v53 }
 0x1de   :  { %v1777_v55 = vpop.f32.mrf.mxu1  ;;  %v2736_v34 = vpop.f32.mrf.mxu0 }
 0x1df   :  { %v1778_v13 = vadd.f32 %v1777_v55, %v1667_v49 }
 0x1e0   :  { %v2777_v51 = vpop.f32.mrf.mxu1  ;;  %v1684_v58 = vpop.f32.mrf.mxu0 }
 0x1e1   :  { %v1805_v31 = vmul.f32 %v1778_v13, %v4290_v9  ;;  %v1685_v9 = vadd.f32 %v1684_v58, %v1540_v56 }
 0x1e2   :  { %v1783_v50 = vpop.f32.mrf.mxu1  ;;  %v2739_v61 = vpop.f32.mrf.mxu0 }
 0x1e3   :  { %v1784_v54 = vadd.f32 %v1783_v50, %v1673_v43 }
 0x1e4   :  { %v2780_v21 = vpop.f32.mrf.mxu1  ;;  %v1690_v30 = vpop.f32.mrf.mxu0 }
 0x1e5   :  { %v1806_v57 = vmul.f32 %v1784_v54, %v4292_v39  ;;  %v1691_v26 = vadd.f32 %v1690_v30, %v1548_v14 }
 0x1e6   :  { %v1789_v60 = vpop.f32.mrf.mxu1  ;;  %v2742_v1 = vpop.f32.mrf.mxu0 }
 0x1e7   :  { %v1810_v52 = vadd.f32 %v1806_v57, %v1805_v31  ;;  %v1790_v15 = vadd.f32 %v1789_v60, %v1679_v46 }
 0x1e8   :  { %v2783_v20 = vpop.f32.mrf.mxu1 }
 0x1e9   :  { %v1807_v16 = vmul.f32 %v1790_v15, %v4294_v40 }
 0x1ea   :  { %v1795_v23 = vpop.f32.mrf.mxu1 }
 0x1eb   :  { %v1811_v45 = vadd.f32 %v1810_v52, %v1807_v16  ;;  %v1796_v18 = vadd.f32 %v1795_v23, %v1685_v9 }
 0x1ec   :  { %v2786_v41 = vpop.f32.mrf.mxu1 }
 0x1ed   :  { %v1808_v28 = vmul.f32 %v1796_v18, %v4296_v17 }
 0x1ee   :  { %v1801_v39 = vpop.f32.mrf.mxu1 }
 0x1ef   :  { %v1812_v32 = vadd.f32 %v1811_v45, %v1808_v28  ;;  %v1802_v36 = vadd.f32 %v1801_v39, %v1691_v26 }
 0x1f0   :  { %v2789_v22 = vpop.f32.mrf.mxu1 }
 0x1f1   :  { %v1809_v19 = vmul.f32 %v1802_v36, %v4298_v62 }
 0x1f3   :  { %v1813_v24 = vadd.f32 %v1812_v32, %v1809_v19 }
 0x1f5   :  { %v1814_v47 = vrot.slane %v1813_v24, 4 }
 0x1f7   :  { %v1815_v59 = vadd.f32 %v1814_v47, %v1813_v24 }
 0x1f9   :  { %v1816_v37 = vrot.slane %v1815_v59, 2 }
 0x1fb   :  { %v1817_v48 = vadd.f32 %v1816_v37, %v1815_v59 }
 0x1fd   :  { %v1818_v40 = vrot.slane %v1817_v48, 1 }
 0x1ff   :  { %v1819_v44 = vadd.f32 %v1818_v40, %v1817_v48 }
 0x201   :  { %v1973_v3 = vmul.f32 -1.442695, %v1819_v44 }
 0x203   :  { %2798 = vpow2.f32 %v1973_v3 }
 0x210   :  { %v2799_v4 = vpop.eup %2798 }
 0x211   :  { %v1823_v5 = vadd.f32 1.0, %v2799_v4 }
 0x213   :  { %2800 = vrcp.f32 %v1823_v5 }
 0x220   :  { %v2801_v17 = vpop.eup %2800 }
 0x221   :  { %1826 = vst [vmem:[#allocation7] sm:$0x1] %v2801_v17 }
 0x222   :  { %2853 = shalt.err (!%p2850_p0)
}
 0x223   :  { %1836 = dma.vmem_to_hbm [thread:$0]  %s1834_s28, 16, %s4312_s4, [#allocation4]  }
 0x224   :  { %2866 = dma.done.wait [#allocation4], 16  }
 0x225   :  { %2867 = vsyncadd [#allocation4], 4294967280 }
 0x226   :  { %1840 = vsyncpa [#allocation3], 1 }
 0x227   :  { %1841 = vsyncpa [#allocation6], 1 }
 0x228   :  { %1842 = vsyncpa [#allocation4], 1 }

</bundles_post_ra>
